<compile_context>
chip_gen: v7x
topology: tpu7x:2x2x1
jax: 0.10.0
libtpu: 0.0.40
codegen_flags: <defaults>
</compile_context>

<pallas_src>
import jax
import jax.numpy as jnp
from jax.experimental import pallas as pl
from jax.experimental.pallas import tpu as pltpu


def _full_block(shape):
    """BlockSpec covering the whole (small) array as a single block."""
    nd = len(shape)
    return pl.BlockSpec(shape, lambda *_: (0,) * nd)


# ----------------------------------------------------------------------------
# Fused decoder kernel factory
# ----------------------------------------------------------------------------
def _make_decoder_kernel(T, B, E, H, V, num_layers):
    bf16 = jnp.bfloat16

    def kernel(cap_ref, feat_ref, emb_ref, *rest):
        # rest = [w_ih, w_hh, bias] * num_layers, w_out, b_out, out_ref
        layers = [(rest[3 * l], rest[3 * l + 1], rest[3 * l + 2])
                  for l in range(num_layers)]
        w_out_ref, b_out_ref, out_ref = rest[3 * num_layers:]

        # ---- embedding gather as a one-hot MXU matmul -----------------------
        cap = cap_ref[...]                                      # (T*B, 1) int32
        col = jax.lax.broadcasted_iota(jnp.int32, (T * B, V), 1)
        onehot = (col == cap).astype(bf16)                      # (T*B, V)
        emb_rows = jnp.dot(onehot, emb_ref[...],
                           preferred_element_type=jnp.float32)  # (T*B, E) f32
        # TODO(synk): Dropout(0.5) on embeddings is identity (eval mode).

        # ---- assemble input sequence: [features ; embed[captions]] ----------
        x = jnp.concatenate([feat_ref[...].astype(jnp.float32), emb_rows],
                            axis=0)                             # (TB, E) f32
        inp = x.astype(bf16)                                    # (TB, E) bf16

        for l in range(num_layers):
            w_ih_ref, w_hh_ref, b_ref = layers[l]
            # Hoisted input projection for the whole sequence (one MXU call).
            gates_x = (jnp.dot(inp, w_ih_ref[...],
                               preferred_element_type=jnp.float32)
                       + b_ref[...])                            # (TB, 4H) f32
            w_hh = w_hh_ref[...]                                # (H, 4H) bf16

            h = jnp.zeros((B, H), jnp.float32)
            c = jnp.zeros((B, H), jnp.float32)
            hs = []
            for t in range(T + 1):                              # serial recurrence
                g = (gates_x[t * B:(t + 1) * B, :]
                     + jnp.dot(h.astype(bf16), w_hh,
                               preferred_element_type=jnp.float32))
                # PyTorch gate order: i, f, g, o
                i_g = jax.nn.sigmoid(g[:, 0 * H:1 * H])
                f_g = jax.nn.sigmoid(g[:, 1 * H:2 * H])
                g_g = jnp.tanh(g[:, 2 * H:3 * H])
                o_g = jax.nn.sigmoid(g[:, 3 * H:4 * H])
                c = f_g * c + i_g * g_g
                h = o_g * jnp.tanh(c)
                hs.append(h)                                    # f32 (B, H)
            inp = jnp.concatenate(hs, axis=0).astype(bf16)      # (TB, H) bf16

        # ---- fused output projection (lane-dense: V on lanes) ---------------
        logits = (jnp.dot(inp, w_out_ref[...],
                          preferred_element_type=jnp.float32)
                  + b_out_ref[...])                             # (TB, V) f32
        out_ref[...] = logits.astype(out_ref.dtype)

    return kernel


# ----------------------------------------------------------------------------
# Full DecoderRNN forward (one pallas_call)
# ----------------------------------------------------------------------------
def decoder_rnn_forward(params, features, captions):
    T, B = captions.shape
    E = params["embed"].shape[1]
    H = params["lstm"][0]["w_hh_t"].shape[0]
    V = params["w_out_t"].shape[1]
    L = len(params["lstm"])
    TB = (T + 1) * B
    bf16 = jnp.bfloat16

    cap = captions.reshape(T * B, 1).astype(jnp.int32)
    feat = features.astype(bf16)
    emb_tab = params["embed"].astype(bf16)

    inputs = [cap, feat, emb_tab]
    in_specs = [_full_block(cap.shape), _full_block(feat.shape),
                _full_block(emb_tab.shape)]
    for layer in params["lstm"]:
        w_ih = layer["w_ih_t"].astype(bf16)
        w_hh = layer["w_hh_t"].astype(bf16)
        bias = layer["bias"].reshape(1, 4 * H)                  # keep f32
        inputs += [w_ih, w_hh, bias]
        in_specs += [_full_block(w_ih.shape), _full_block(w_hh.shape),
                     _full_block(bias.shape)]
    w_out = params["w_out_t"].astype(bf16)
    b_out = params["b_out"].reshape(1, V)                       # keep f32
    inputs += [w_out, b_out]
    in_specs += [_full_block(w_out.shape), _full_block(b_out.shape)]

    kernel = _make_decoder_kernel(T, B, E, H, V, L)
    out = pl.pallas_call(
        kernel,
        out_shape=jax.ShapeDtypeStruct((TB, V), jnp.float32),
        grid=(1,),
        in_specs=in_specs,
        out_specs=_full_block((TB, V)),
        compiler_params=pltpu.CompilerParams(
            dimension_semantics=("arbitrary",)),
    )(*inputs)
    return out.reshape(T + 1, B, V)


# ----------------------------------------------------------------------------
# Pure-JAX reference (mirrors the bf16-matmul / f32-accumulate numerics)
# ----------------------------------------------------------------------------
def decoder_rnn_reference(params, features, captions):
    bf16 = jnp.bfloat16
    emb = jnp.take(params["embed"].astype(bf16), captions, axis=0)   # (T,B,E)
    x = jnp.concatenate([features.astype(bf16)[None], emb], axis=0)  # (T+1,B,E)

    def run_layer(x_seq, layer):
        w_ih = layer["w_ih_t"].astype(bf16)
        w_hh = layer["w_hh_t"].astype(bf16)
        bias = layer["bias"]
        H = w_hh.shape[0]
        B = x_seq.shape[1]

        def step(carry, x_t):
            h, c = carry
            gates = (jnp.dot(x_t, w_ih, preferred_element_type=jnp.float32)
                     + jnp.dot(h.astype(bf16), w_hh,
                               preferred_element_type=jnp.float32)
                     + bias)
            i_g = jax.nn.sigmoid(gates[:, 0 * H:1 * H])
            f_g = jax.nn.sigmoid(gates[:, 1 * H:2 * H])
            g_g = jnp.tanh(gates[:, 2 * H:3 * H])
            o_g = jax.nn.sigmoid(gates[:, 3 * H:4 * H])
            c_new = f_g * c + i_g * g_g
            h_new = o_g * jnp.tanh(c_new)
            return (h_new, c_new), h_new.astype(bf16)

        init = (jnp.zeros((B, H), jnp.float32),
                jnp.zeros((B, H), jnp.float32))
        _, hs = jax.lax.scan(step, init, x_seq)
        return hs

    for layer in params["lstm"]:
        x = run_layer(x, layer)
    T1, B, H = x.shape
    logits = (jnp.dot(x.reshape(T1 * B, H), params["w_out_t"].astype(bf16),
                      preferred_element_type=jnp.float32)
              + params["b_out"])
    return logits.reshape(T1, B, -1)


def init_params(key, embed_size, hidden_size, vocab_size, num_layers):
    keys = jax.random.split(key, 3 + 3 * num_layers)
    scale = 0.1
    params = {
        "embed": scale * jax.random.normal(
            keys[0], (vocab_size, embed_size), jnp.float32),
        "w_out_t": scale * jax.random.normal(
            keys[1], (hidden_size, vocab_size), jnp.float32),
        "b_out": scale * jax.random.normal(keys[2], (vocab_size,), jnp.float32),
        "lstm": [],
    }
    for l in range(num_layers):
        in_size = embed_size if l == 0 else hidden_size
        k0, k1, k2 = keys[3 + 3 * l:6 + 3 * l]
        params["lstm"].append({
            # stored already transposed: x @ W_ih^T  ->  x @ w_ih_t
            "w_ih_t": scale * jax.random.normal(
                k0, (in_size, 4 * hidden_size), jnp.float32),
            "w_hh_t": scale * jax.random.normal(
                k1, (hidden_size, 4 * hidden_size), jnp.float32),
            # b_ih + b_hh folded into one bias (equivalent to PyTorch)
            "bias": scale * jax.random.normal(
                k2, (4 * hidden_size,), jnp.float32),
        })
    return params


if __name__ == "__main__":
    embed_size, hidden_size, vocab_size, num_layers = 32, 32, 128, 2
    T, B = 8, 2

    key = jax.random.PRNGKey(0)
    k_param, k_feat, k_cap = jax.random.split(key, 3)

    params = init_params(k_param, embed_size, hidden_size, vocab_size,
                         num_layers)
    features = jax.random.normal(k_feat, (B, embed_size), jnp.float32)
    captions = jax.random.randint(k_cap, (T, B), 0, vocab_size, jnp.int32)

    out = decoder_rnn_forward(params, features, captions)
    out = jax.block_until_ready(out)

    assert out.shape == (T + 1, B, vocab_size), out.shape

    ref = decoder_rnn_reference(params, features, captions)
    ref = jax.block_until_ready(ref)
    max_err = float(jnp.max(jnp.abs(out - ref)))
    assert jnp.allclose(out, ref, atol=2e-3, rtol=2e-3), max_err

    print("KERNEL_OK")
</pallas_src>

<mosaic_0001>
module attributes {stable_mosaic.version = 11 : i64} {
  func.func @kernel(%arg0: i32, %arg1: memref<16x1xi32, #tpu.memory_space<vmem>>, %arg2: memref<2x32xbf16, #tpu.memory_space<vmem>>, %arg3: memref<128x32xbf16, #tpu.memory_space<vmem>>, %arg4: memref<32x128xbf16, #tpu.memory_space<vmem>>, %arg5: memref<32x128xbf16, #tpu.memory_space<vmem>>, %arg6: memref<1x128xf32, #tpu.memory_space<vmem>>, %arg7: memref<32x128xbf16, #tpu.memory_space<vmem>>, %arg8: memref<32x128xbf16, #tpu.memory_space<vmem>>, %arg9: memref<1x128xf32, #tpu.memory_space<vmem>>, %arg10: memref<32x128xbf16, #tpu.memory_space<vmem>>, %arg11: memref<1x128xf32, #tpu.memory_space<vmem>>, %arg12: memref<18x128xf32, #tpu.memory_space<vmem>>) attributes {dimension_semantics = [#tpu.dimension_semantics<arbitrary>], iteration_bounds = array<i64: 1>, scalar_prefetch = 0 : i64, scratch_operands = 0 : i64, tpu.core_type = #tpu.core_type<tc>, window_params = [{pipeline_mode = #tpu.pipeline_mode<synchronous>, transform_indices = @transform_0, window_bounds = array<i64: 16, 1>}, {pipeline_mode = #tpu.pipeline_mode<synchronous>, transform_indices = @transform_1, window_bounds = array<i64: 2, 32>}, {pipeline_mode = #tpu.pipeline_mode<synchronous>, transform_indices = @transform_2, window_bounds = array<i64: 128, 32>}, {pipeline_mode = #tpu.pipeline_mode<synchronous>, transform_indices = @transform_3, window_bounds = array<i64: 32, 128>}, {pipeline_mode = #tpu.pipeline_mode<synchronous>, transform_indices = @transform_4, window_bounds = array<i64: 32, 128>}, {pipeline_mode = #tpu.pipeline_mode<synchronous>, transform_indices = @transform_5, window_bounds = array<i64: 1, 128>}, {pipeline_mode = #tpu.pipeline_mode<synchronous>, transform_indices = @transform_6, window_bounds = array<i64: 32, 128>}, {pipeline_mode = #tpu.pipeline_mode<synchronous>, transform_indices = @transform_7, window_bounds = array<i64: 32, 128>}, {pipeline_mode = #tpu.pipeline_mode<synchronous>, transform_indices = @transform_8, window_bounds = array<i64: 1, 128>}, {pipeline_mode = #tpu.pipeline_mode<synchronous>, transform_indices = @transform_9, window_bounds = array<i64: 32, 128>}, {pipeline_mode = #tpu.pipeline_mode<synchronous>, transform_indices = @transform_10, window_bounds = array<i64: 1, 128>}, {pipeline_mode = #tpu.pipeline_mode<synchronous>, transform_indices = @transform_11, window_bounds = array<i64: 18, 128>}]} {
    %c0 = arith.constant 0 : index
    %c0_0 = arith.constant 0 : index
    %0 = vector.load %arg1[%c0, %c0_0] : memref<16x1xi32, #tpu.memory_space<vmem>>, vector<16x1xi32>
    %1 = tpu.iota {dimensions = array<i32: 1>} : vector<16x128xi32>
    %2 = vector.broadcast %0 : vector<16x1xi32> to vector<16x128xi32>
    %3 = arith.cmpi eq, %1, %2 : vector<16x128xi32>
    %4 = arith.extui %3 : vector<16x128xi1> to vector<16x128xi32>
    %5 = arith.sitofp %4 : vector<16x128xi32> to vector<16x128xf32>
    %6 = arith.truncf %5 : vector<16x128xf32> to vector<16x128xbf16>
    %c0_1 = arith.constant 0 : index
    %c0_2 = arith.constant 0 : index
    %7 = vector.load %arg3[%c0_1, %c0_2] : memref<128x32xbf16, #tpu.memory_space<vmem>>, vector<128x32xbf16>
    %cst = arith.constant dense<0.000000e+00> : vector<16x32xf32>
    %8 = tpu.matmul %6, %7, %cst {dimension_numbers = #tpu.dot_dimension_numbers<[1], [0], [0], [1], [0, 0, 1, 1], [], []>} : vector<16x128xbf16>, vector<128x32xbf16>, vector<16x32xf32> -> vector<16x32xf32>
    %c0_3 = arith.constant 0 : index
    %c0_4 = arith.constant 0 : index
    %9 = vector.load %arg2[%c0_3, %c0_4] : memref<2x32xbf16, #tpu.memory_space<vmem>>, vector<2x32xbf16>
    %10 = arith.extf %9 : vector<2x32xbf16> to vector<2x32xf32>
    %11 = tpu.concatenate %10, %8 in 0 : vector<2x32xf32>, vector<16x32xf32> -> vector<18x32xf32>
    %12 = arith.truncf %11 : vector<18x32xf32> to vector<18x32xbf16>
    %c0_5 = arith.constant 0 : index
    %c0_6 = arith.constant 0 : index
    %13 = vector.load %arg4[%c0_5, %c0_6] : memref<32x128xbf16, #tpu.memory_space<vmem>>, vector<32x128xbf16>
    %cst_7 = arith.constant dense<0.000000e+00> : vector<18x128xf32>
    %14 = tpu.matmul %12, %13, %cst_7 {dimension_numbers = #tpu.dot_dimension_numbers<[1], [0], [0], [1], [0, 0, 1, 1], [], []>} : vector<18x32xbf16>, vector<32x128xbf16>, vector<18x128xf32> -> vector<18x128xf32>
    %c0_8 = arith.constant 0 : index
    %c0_9 = arith.constant 0 : index
    %15 = vector.load %arg6[%c0_8, %c0_9] : memref<1x128xf32, #tpu.memory_space<vmem>>, vector<1x128xf32>
    %16 = vector.broadcast %15 : vector<1x128xf32> to vector<18x128xf32>
    %17 = arith.addf %14, %16 : vector<18x128xf32>
    %c0_10 = arith.constant 0 : index
    %c0_11 = arith.constant 0 : index
    %18 = vector.load %arg5[%c0_10, %c0_11] : memref<32x128xbf16, #tpu.memory_space<vmem>>, vector<32x128xbf16>
    %cst_12 = arith.constant 0.000000e+00 : f32
    %19 = vector.broadcast %cst_12 : f32 to vector<2x32xf32>
    %cst_13 = arith.constant 0.000000e+00 : f32
    %20 = vector.broadcast %cst_13 : f32 to vector<2x32xf32>
    %21 = vector.extract_strided_slice %17 {offsets = [0, 0], sizes = [2, 128], strides = [1, 1]} : vector<18x128xf32> to vector<2x128xf32>
    %22 = arith.truncf %19 : vector<2x32xf32> to vector<2x32xbf16>
    %cst_14 = arith.constant dense<0.000000e+00> : vector<2x128xf32>
    %23 = tpu.matmul %22, %18, %cst_14 {dimension_numbers = #tpu.dot_dimension_numbers<[1], [0], [0], [1], [0, 0, 1, 1], [], []>} : vector<2x32xbf16>, vector<32x128xbf16>, vector<2x128xf32> -> vector<2x128xf32>
    %24 = arith.addf %21, %23 : vector<2x128xf32>
    %25 = vector.extract_strided_slice %24 {offsets = [0, 0], sizes = [2, 32], strides = [1, 1]} : vector<2x128xf32> to vector<2x32xf32>
    %26 = arith.negf %25 : vector<2x32xf32>
    %27 = math.exp %26 : vector<2x32xf32>
    %cst_15 = arith.constant 1.000000e+00 : f32
    %28 = vector.broadcast %cst_15 : f32 to vector<2x32xf32>
    %29 = arith.addf %28, %27 : vector<2x32xf32>
    %30 = arith.divf %28, %29 : vector<2x32xf32>
    %31 = vector.extract_strided_slice %24 {offsets = [0, 32], sizes = [2, 32], strides = [1, 1]} : vector<2x128xf32> to vector<2x32xf32>
    %32 = arith.negf %31 : vector<2x32xf32>
    %33 = math.exp %32 : vector<2x32xf32>
    %cst_16 = arith.constant 1.000000e+00 : f32
    %34 = vector.broadcast %cst_16 : f32 to vector<2x32xf32>
    %35 = arith.addf %34, %33 : vector<2x32xf32>
    %36 = arith.divf %34, %35 : vector<2x32xf32>
    %37 = vector.extract_strided_slice %24 {offsets = [0, 64], sizes = [2, 32], strides = [1, 1]} : vector<2x128xf32> to vector<2x32xf32>
    %38 = math.tanh %37 : vector<2x32xf32>
    %39 = vector.extract_strided_slice %24 {offsets = [0, 96], sizes = [2, 32], strides = [1, 1]} : vector<2x128xf32> to vector<2x32xf32>
    %40 = arith.negf %39 : vector<2x32xf32>
    %41 = math.exp %40 : vector<2x32xf32>
    %cst_17 = arith.constant 1.000000e+00 : f32
    %42 = vector.broadcast %cst_17 : f32 to vector<2x32xf32>
    %43 = arith.addf %42, %41 : vector<2x32xf32>
    %44 = arith.divf %42, %43 : vector<2x32xf32>
    %45 = arith.mulf %36, %20 : vector<2x32xf32>
    %46 = arith.mulf %30, %38 : vector<2x32xf32>
    %47 = arith.addf %45, %46 : vector<2x32xf32>
    %48 = math.tanh %47 : vector<2x32xf32>
    %49 = arith.mulf %44, %48 : vector<2x32xf32>
    %50 = vector.extract_strided_slice %17 {offsets = [2, 0], sizes = [2, 128], strides = [1, 1]} : vector<18x128xf32> to vector<2x128xf32>
    %51 = arith.truncf %49 : vector<2x32xf32> to vector<2x32xbf16>
    %cst_18 = arith.constant dense<0.000000e+00> : vector<2x128xf32>
    %52 = tpu.matmul %51, %18, %cst_18 {dimension_numbers = #tpu.dot_dimension_numbers<[1], [0], [0], [1], [0, 0, 1, 1], [], []>} : vector<2x32xbf16>, vector<32x128xbf16>, vector<2x128xf32> -> vector<2x128xf32>
    %53 = arith.addf %50, %52 : vector<2x128xf32>
    %54 = vector.extract_strided_slice %53 {offsets = [0, 0], sizes = [2, 32], strides = [1, 1]} : vector<2x128xf32> to vector<2x32xf32>
    %55 = arith.negf %54 : vector<2x32xf32>
    %56 = math.exp %55 : vector<2x32xf32>
    %cst_19 = arith.constant 1.000000e+00 : f32
    %57 = vector.broadcast %cst_19 : f32 to vector<2x32xf32>
    %58 = arith.addf %57, %56 : vector<2x32xf32>
    %59 = arith.divf %57, %58 : vector<2x32xf32>
    %60 = vector.extract_strided_slice %53 {offsets = [0, 32], sizes = [2, 32], strides = [1, 1]} : vector<2x128xf32> to vector<2x32xf32>
    %61 = arith.negf %60 : vector<2x32xf32>
    %62 = math.exp %61 : vector<2x32xf32>
    %cst_20 = arith.constant 1.000000e+00 : f32
    %63 = vector.broadcast %cst_20 : f32 to vector<2x32xf32>
    %64 = arith.addf %63, %62 : vector<2x32xf32>
    %65 = arith.divf %63, %64 : vector<2x32xf32>
    %66 = vector.extract_strided_slice %53 {offsets = [0, 64], sizes = [2, 32], strides = [1, 1]} : vector<2x128xf32> to vector<2x32xf32>
    %67 = math.tanh %66 : vector<2x32xf32>
    %68 = vector.extract_strided_slice %53 {offsets = [0, 96], sizes = [2, 32], strides = [1, 1]} : vector<2x128xf32> to vector<2x32xf32>
    %69 = arith.negf %68 : vector<2x32xf32>
    %70 = math.exp %69 : vector<2x32xf32>
    %cst_21 = arith.constant 1.000000e+00 : f32
    %71 = vector.broadcast %cst_21 : f32 to vector<2x32xf32>
    %72 = arith.addf %71, %70 : vector<2x32xf32>
    %73 = arith.divf %71, %72 : vector<2x32xf32>
    %74 = arith.mulf %65, %47 : vector<2x32xf32>
    %75 = arith.mulf %59, %67 : vector<2x32xf32>
    %76 = arith.addf %74, %75 : vector<2x32xf32>
    %77 = math.tanh %76 : vector<2x32xf32>
    %78 = arith.mulf %73, %77 : vector<2x32xf32>
    %79 = vector.extract_strided_slice %17 {offsets = [4, 0], sizes = [2, 128], strides = [1, 1]} : vector<18x128xf32> to vector<2x128xf32>
    %80 = arith.truncf %78 : vector<2x32xf32> to vector<2x32xbf16>
    %cst_22 = arith.constant dense<0.000000e+00> : vector<2x128xf32>
    %81 = tpu.matmul %80, %18, %cst_22 {dimension_numbers = #tpu.dot_dimension_numbers<[1], [0], [0], [1], [0, 0, 1, 1], [], []>} : vector<2x32xbf16>, vector<32x128xbf16>, vector<2x128xf32> -> vector<2x128xf32>
    %82 = arith.addf %79, %81 : vector<2x128xf32>
    %83 = vector.extract_strided_slice %82 {offsets = [0, 0], sizes = [2, 32], strides = [1, 1]} : vector<2x128xf32> to vector<2x32xf32>
    %84 = arith.negf %83 : vector<2x32xf32>
    %85 = math.exp %84 : vector<2x32xf32>
    %cst_23 = arith.constant 1.000000e+00 : f32
    %86 = vector.broadcast %cst_23 : f32 to vector<2x32xf32>
    %87 = arith.addf %86, %85 : vector<2x32xf32>
    %88 = arith.divf %86, %87 : vector<2x32xf32>
    %89 = vector.extract_strided_slice %82 {offsets = [0, 32], sizes = [2, 32], strides = [1, 1]} : vector<2x128xf32> to vector<2x32xf32>
    %90 = arith.negf %89 : vector<2x32xf32>
    %91 = math.exp %90 : vector<2x32xf32>
    %cst_24 = arith.constant 1.000000e+00 : f32
    %92 = vector.broadcast %cst_24 : f32 to vector<2x32xf32>
    %93 = arith.addf %92, %91 : vector<2x32xf32>
    %94 = arith.divf %92, %93 : vector<2x32xf32>
    %95 = vector.extract_strided_slice %82 {offsets = [0, 64], sizes = [2, 32], strides = [1, 1]} : vector<2x128xf32> to vector<2x32xf32>
    %96 = math.tanh %95 : vector<2x32xf32>
    %97 = vector.extract_strided_slice %82 {offsets = [0, 96], sizes = [2, 32], strides = [1, 1]} : vector<2x128xf32> to vector<2x32xf32>
    %98 = arith.negf %97 : vector<2x32xf32>
    %99 = math.exp %98 : vector<2x32xf32>
    %cst_25 = arith.constant 1.000000e+00 : f32
    %100 = vector.broadcast %cst_25 : f32 to vector<2x32xf32>
    %101 = arith.addf %100, %99 : vector<2x32xf32>
    %102 = arith.divf %100, %101 : vector<2x32xf32>
    %103 = arith.mulf %94, %76 : vector<2x32xf32>
    %104 = arith.mulf %88, %96 : vector<2x32xf32>
    %105 = arith.addf %103, %104 : vector<2x32xf32>
    %106 = math.tanh %105 : vector<2x32xf32>
    %107 = arith.mulf %102, %106 : vector<2x32xf32>
    %108 = vector.extract_strided_slice %17 {offsets = [6, 0], sizes = [2, 128], strides = [1, 1]} : vector<18x128xf32> to vector<2x128xf32>
    %109 = arith.truncf %107 : vector<2x32xf32> to vector<2x32xbf16>
    %cst_26 = arith.constant dense<0.000000e+00> : vector<2x128xf32>
    %110 = tpu.matmul %109, %18, %cst_26 {dimension_numbers = #tpu.dot_dimension_numbers<[1], [0], [0], [1], [0, 0, 1, 1], [], []>} : vector<2x32xbf16>, vector<32x128xbf16>, vector<2x128xf32> -> vector<2x128xf32>
    %111 = arith.addf %108, %110 : vector<2x128xf32>
    %112 = vector.extract_strided_slice %111 {offsets = [0, 0], sizes = [2, 32], strides = [1, 1]} : vector<2x128xf32> to vector<2x32xf32>
    %113 = arith.negf %112 : vector<2x32xf32>
    %114 = math.exp %113 : vector<2x32xf32>
    %cst_27 = arith.constant 1.000000e+00 : f32
    %115 = vector.broadcast %cst_27 : f32 to vector<2x32xf32>
    %116 = arith.addf %115, %114 : vector<2x32xf32>
    %117 = arith.divf %115, %116 : vector<2x32xf32>
    %118 = vector.extract_strided_slice %111 {offsets = [0, 32], sizes = [2, 32], strides = [1, 1]} : vector<2x128xf32> to vector<2x32xf32>
    %119 = arith.negf %118 : vector<2x32xf32>
    %120 = math.exp %119 : vector<2x32xf32>
    %cst_28 = arith.constant 1.000000e+00 : f32
    %121 = vector.broadcast %cst_28 : f32 to vector<2x32xf32>
    %122 = arith.addf %121, %120 : vector<2x32xf32>
    %123 = arith.divf %121, %122 : vector<2x32xf32>
    %124 = vector.extract_strided_slice %111 {offsets = [0, 64], sizes = [2, 32], strides = [1, 1]} : vector<2x128xf32> to vector<2x32xf32>
    %125 = math.tanh %124 : vector<2x32xf32>
    %126 = vector.extract_strided_slice %111 {offsets = [0, 96], sizes = [2, 32], strides = [1, 1]} : vector<2x128xf32> to vector<2x32xf32>
    %127 = arith.negf %126 : vector<2x32xf32>
    %128 = math.exp %127 : vector<2x32xf32>
    %cst_29 = arith.constant 1.000000e+00 : f32
    %129 = vector.broadcast %cst_29 : f32 to vector<2x32xf32>
    %130 = arith.addf %129, %128 : vector<2x32xf32>
    %131 = arith.divf %129, %130 : vector<2x32xf32>
    %132 = arith.mulf %123, %105 : vector<2x32xf32>
    %133 = arith.mulf %117, %125 : vector<2x32xf32>
    %134 = arith.addf %132, %133 : vector<2x32xf32>
    %135 = math.tanh %134 : vector<2x32xf32>
    %136 = arith.mulf %131, %135 : vector<2x32xf32>
    %137 = vector.extract_strided_slice %17 {offsets = [8, 0], sizes = [2, 128], strides = [1, 1]} : vector<18x128xf32> to vector<2x128xf32>
    %138 = arith.truncf %136 : vector<2x32xf32> to vector<2x32xbf16>
    %cst_30 = arith.constant dense<0.000000e+00> : vector<2x128xf32>
    %139 = tpu.matmul %138, %18, %cst_30 {dimension_numbers = #tpu.dot_dimension_numbers<[1], [0], [0], [1], [0, 0, 1, 1], [], []>} : vector<2x32xbf16>, vector<32x128xbf16>, vector<2x128xf32> -> vector<2x128xf32>
    %140 = arith.addf %137, %139 : vector<2x128xf32>
    %141 = vector.extract_strided_slice %140 {offsets = [0, 0], sizes = [2, 32], strides = [1, 1]} : vector<2x128xf32> to vector<2x32xf32>
    %142 = arith.negf %141 : vector<2x32xf32>
    %143 = math.exp %142 : vector<2x32xf32>
    %cst_31 = arith.constant 1.000000e+00 : f32
    %144 = vector.broadcast %cst_31 : f32 to vector<2x32xf32>
    %145 = arith.addf %144, %143 : vector<2x32xf32>
    %146 = arith.divf %144, %145 : vector<2x32xf32>
    %147 = vector.extract_strided_slice %140 {offsets = [0, 32], sizes = [2, 32], strides = [1, 1]} : vector<2x128xf32> to vector<2x32xf32>
    %148 = arith.negf %147 : vector<2x32xf32>
    %149 = math.exp %148 : vector<2x32xf32>
    %cst_32 = arith.constant 1.000000e+00 : f32
    %150 = vector.broadcast %cst_32 : f32 to vector<2x32xf32>
    %151 = arith.addf %150, %149 : vector<2x32xf32>
    %152 = arith.divf %150, %151 : vector<2x32xf32>
    %153 = vector.extract_strided_slice %140 {offsets = [0, 64], sizes = [2, 32], strides = [1, 1]} : vector<2x128xf32> to vector<2x32xf32>
    %154 = math.tanh %153 : vector<2x32xf32>
    %155 = vector.extract_strided_slice %140 {offsets = [0, 96], sizes = [2, 32], strides = [1, 1]} : vector<2x128xf32> to vector<2x32xf32>
    %156 = arith.negf %155 : vector<2x32xf32>
    %157 = math.exp %156 : vector<2x32xf32>
    %cst_33 = arith.constant 1.000000e+00 : f32
    %158 = vector.broadcast %cst_33 : f32 to vector<2x32xf32>
    %159 = arith.addf %158, %157 : vector<2x32xf32>
    %160 = arith.divf %158, %159 : vector<2x32xf32>
    %161 = arith.mulf %152, %134 : vector<2x32xf32>
    %162 = arith.mulf %146, %154 : vector<2x32xf32>
    %163 = arith.addf %161, %162 : vector<2x32xf32>
    %164 = math.tanh %163 : vector<2x32xf32>
    %165 = arith.mulf %160, %164 : vector<2x32xf32>
    %166 = vector.extract_strided_slice %17 {offsets = [10, 0], sizes = [2, 128], strides = [1, 1]} : vector<18x128xf32> to vector<2x128xf32>
    %167 = arith.truncf %165 : vector<2x32xf32> to vector<2x32xbf16>
    %cst_34 = arith.constant dense<0.000000e+00> : vector<2x128xf32>
    %168 = tpu.matmul %167, %18, %cst_34 {dimension_numbers = #tpu.dot_dimension_numbers<[1], [0], [0], [1], [0, 0, 1, 1], [], []>} : vector<2x32xbf16>, vector<32x128xbf16>, vector<2x128xf32> -> vector<2x128xf32>
    %169 = arith.addf %166, %168 : vector<2x128xf32>
    %170 = vector.extract_strided_slice %169 {offsets = [0, 0], sizes = [2, 32], strides = [1, 1]} : vector<2x128xf32> to vector<2x32xf32>
    %171 = arith.negf %170 : vector<2x32xf32>
    %172 = math.exp %171 : vector<2x32xf32>
    %cst_35 = arith.constant 1.000000e+00 : f32
    %173 = vector.broadcast %cst_35 : f32 to vector<2x32xf32>
    %174 = arith.addf %173, %172 : vector<2x32xf32>
    %175 = arith.divf %173, %174 : vector<2x32xf32>
    %176 = vector.extract_strided_slice %169 {offsets = [0, 32], sizes = [2, 32], strides = [1, 1]} : vector<2x128xf32> to vector<2x32xf32>
    %177 = arith.negf %176 : vector<2x32xf32>
    %178 = math.exp %177 : vector<2x32xf32>
    %cst_36 = arith.constant 1.000000e+00 : f32
    %179 = vector.broadcast %cst_36 : f32 to vector<2x32xf32>
    %180 = arith.addf %179, %178 : vector<2x32xf32>
    %181 = arith.divf %179, %180 : vector<2x32xf32>
    %182 = vector.extract_strided_slice %169 {offsets = [0, 64], sizes = [2, 32], strides = [1, 1]} : vector<2x128xf32> to vector<2x32xf32>
    %183 = math.tanh %182 : vector<2x32xf32>
    %184 = vector.extract_strided_slice %169 {offsets = [0, 96], sizes = [2, 32], strides = [1, 1]} : vector<2x128xf32> to vector<2x32xf32>
    %185 = arith.negf %184 : vector<2x32xf32>
    %186 = math.exp %185 : vector<2x32xf32>
    %cst_37 = arith.constant 1.000000e+00 : f32
    %187 = vector.broadcast %cst_37 : f32 to vector<2x32xf32>
    %188 = arith.addf %187, %186 : vector<2x32xf32>
    %189 = arith.divf %187, %188 : vector<2x32xf32>
    %190 = arith.mulf %181, %163 : vector<2x32xf32>
    %191 = arith.mulf %175, %183 : vector<2x32xf32>
    %192 = arith.addf %190, %191 : vector<2x32xf32>
    %193 = math.tanh %192 : vector<2x32xf32>
    %194 = arith.mulf %189, %193 : vector<2x32xf32>
    %195 = vector.extract_strided_slice %17 {offsets = [12, 0], sizes = [2, 128], strides = [1, 1]} : vector<18x128xf32> to vector<2x128xf32>
    %196 = arith.truncf %194 : vector<2x32xf32> to vector<2x32xbf16>
    %cst_38 = arith.constant dense<0.000000e+00> : vector<2x128xf32>
    %197 = tpu.matmul %196, %18, %cst_38 {dimension_numbers = #tpu.dot_dimension_numbers<[1], [0], [0], [1], [0, 0, 1, 1], [], []>} : vector<2x32xbf16>, vector<32x128xbf16>, vector<2x128xf32> -> vector<2x128xf32>
    %198 = arith.addf %195, %197 : vector<2x128xf32>
    %199 = vector.extract_strided_slice %198 {offsets = [0, 0], sizes = [2, 32], strides = [1, 1]} : vector<2x128xf32> to vector<2x32xf32>
    %200 = arith.negf %199 : vector<2x32xf32>
    %201 = math.exp %200 : vector<2x32xf32>
    %cst_39 = arith.constant 1.000000e+00 : f32
    %202 = vector.broadcast %cst_39 : f32 to vector<2x32xf32>
    %203 = arith.addf %202, %201 : vector<2x32xf32>
    %204 = arith.divf %202, %203 : vector<2x32xf32>
    %205 = vector.extract_strided_slice %198 {offsets = [0, 32], sizes = [2, 32], strides = [1, 1]} : vector<2x128xf32> to vector<2x32xf32>
    %206 = arith.negf %205 : vector<2x32xf32>
    %207 = math.exp %206 : vector<2x32xf32>
    %cst_40 = arith.constant 1.000000e+00 : f32
    %208 = vector.broadcast %cst_40 : f32 to vector<2x32xf32>
    %209 = arith.addf %208, %207 : vector<2x32xf32>
    %210 = arith.divf %208, %209 : vector<2x32xf32>
    %211 = vector.extract_strided_slice %198 {offsets = [0, 64], sizes = [2, 32], strides = [1, 1]} : vector<2x128xf32> to vector<2x32xf32>
    %212 = math.tanh %211 : vector<2x32xf32>
    %213 = vector.extract_strided_slice %198 {offsets = [0, 96], sizes = [2, 32], strides = [1, 1]} : vector<2x128xf32> to vector<2x32xf32>
    %214 = arith.negf %213 : vector<2x32xf32>
    %215 = math.exp %214 : vector<2x32xf32>
    %cst_41 = arith.constant 1.000000e+00 : f32
    %216 = vector.broadcast %cst_41 : f32 to vector<2x32xf32>
    %217 = arith.addf %216, %215 : vector<2x32xf32>
    %218 = arith.divf %216, %217 : vector<2x32xf32>
    %219 = arith.mulf %210, %192 : vector<2x32xf32>
    %220 = arith.mulf %204, %212 : vector<2x32xf32>
    %221 = arith.addf %219, %220 : vector<2x32xf32>
    %222 = math.tanh %221 : vector<2x32xf32>
    %223 = arith.mulf %218, %222 : vector<2x32xf32>
    %224 = vector.extract_strided_slice %17 {offsets = [14, 0], sizes = [2, 128], strides = [1, 1]} : vector<18x128xf32> to vector<2x128xf32>
    %225 = arith.truncf %223 : vector<2x32xf32> to vector<2x32xbf16>
    %cst_42 = arith.constant dense<0.000000e+00> : vector<2x128xf32>
    %226 = tpu.matmul %225, %18, %cst_42 {dimension_numbers = #tpu.dot_dimension_numbers<[1], [0], [0], [1], [0, 0, 1, 1], [], []>} : vector<2x32xbf16>, vector<32x128xbf16>, vector<2x128xf32> -> vector<2x128xf32>
    %227 = arith.addf %224, %226 : vector<2x128xf32>
    %228 = vector.extract_strided_slice %227 {offsets = [0, 0], sizes = [2, 32], strides = [1, 1]} : vector<2x128xf32> to vector<2x32xf32>
    %229 = arith.negf %228 : vector<2x32xf32>
    %230 = math.exp %229 : vector<2x32xf32>
    %cst_43 = arith.constant 1.000000e+00 : f32
    %231 = vector.broadcast %cst_43 : f32 to vector<2x32xf32>
    %232 = arith.addf %231, %230 : vector<2x32xf32>
    %233 = arith.divf %231, %232 : vector<2x32xf32>
    %234 = vector.extract_strided_slice %227 {offsets = [0, 32], sizes = [2, 32], strides = [1, 1]} : vector<2x128xf32> to vector<2x32xf32>
    %235 = arith.negf %234 : vector<2x32xf32>
    %236 = math.exp %235 : vector<2x32xf32>
    %cst_44 = arith.constant 1.000000e+00 : f32
    %237 = vector.broadcast %cst_44 : f32 to vector<2x32xf32>
    %238 = arith.addf %237, %236 : vector<2x32xf32>
    %239 = arith.divf %237, %238 : vector<2x32xf32>
    %240 = vector.extract_strided_slice %227 {offsets = [0, 64], sizes = [2, 32], strides = [1, 1]} : vector<2x128xf32> to vector<2x32xf32>
    %241 = math.tanh %240 : vector<2x32xf32>
    %242 = vector.extract_strided_slice %227 {offsets = [0, 96], sizes = [2, 32], strides = [1, 1]} : vector<2x128xf32> to vector<2x32xf32>
    %243 = arith.negf %242 : vector<2x32xf32>
    %244 = math.exp %243 : vector<2x32xf32>
    %cst_45 = arith.constant 1.000000e+00 : f32
    %245 = vector.broadcast %cst_45 : f32 to vector<2x32xf32>
    %246 = arith.addf %245, %244 : vector<2x32xf32>
    %247 = arith.divf %245, %246 : vector<2x32xf32>
    %248 = arith.mulf %239, %221 : vector<2x32xf32>
    %249 = arith.mulf %233, %241 : vector<2x32xf32>
    %250 = arith.addf %248, %249 : vector<2x32xf32>
    %251 = math.tanh %250 : vector<2x32xf32>
    %252 = arith.mulf %247, %251 : vector<2x32xf32>
    %253 = vector.extract_strided_slice %17 {offsets = [16, 0], sizes = [2, 128], strides = [1, 1]} : vector<18x128xf32> to vector<2x128xf32>
    %254 = arith.truncf %252 : vector<2x32xf32> to vector<2x32xbf16>
    %cst_46 = arith.constant dense<0.000000e+00> : vector<2x128xf32>
    %255 = tpu.matmul %254, %18, %cst_46 {dimension_numbers = #tpu.dot_dimension_numbers<[1], [0], [0], [1], [0, 0, 1, 1], [], []>} : vector<2x32xbf16>, vector<32x128xbf16>, vector<2x128xf32> -> vector<2x128xf32>
    %256 = arith.addf %253, %255 : vector<2x128xf32>
    %257 = vector.extract_strided_slice %256 {offsets = [0, 0], sizes = [2, 32], strides = [1, 1]} : vector<2x128xf32> to vector<2x32xf32>
    %258 = arith.negf %257 : vector<2x32xf32>
    %259 = math.exp %258 : vector<2x32xf32>
    %cst_47 = arith.constant 1.000000e+00 : f32
    %260 = vector.broadcast %cst_47 : f32 to vector<2x32xf32>
    %261 = arith.addf %260, %259 : vector<2x32xf32>
    %262 = arith.divf %260, %261 : vector<2x32xf32>
    %263 = vector.extract_strided_slice %256 {offsets = [0, 32], sizes = [2, 32], strides = [1, 1]} : vector<2x128xf32> to vector<2x32xf32>
    %264 = arith.negf %263 : vector<2x32xf32>
    %265 = math.exp %264 : vector<2x32xf32>
    %cst_48 = arith.constant 1.000000e+00 : f32
    %266 = vector.broadcast %cst_48 : f32 to vector<2x32xf32>
    %267 = arith.addf %266, %265 : vector<2x32xf32>
    %268 = arith.divf %266, %267 : vector<2x32xf32>
    %269 = vector.extract_strided_slice %256 {offsets = [0, 64], sizes = [2, 32], strides = [1, 1]} : vector<2x128xf32> to vector<2x32xf32>
    %270 = math.tanh %269 : vector<2x32xf32>
    %271 = vector.extract_strided_slice %256 {offsets = [0, 96], sizes = [2, 32], strides = [1, 1]} : vector<2x128xf32> to vector<2x32xf32>
    %272 = arith.negf %271 : vector<2x32xf32>
    %273 = math.exp %272 : vector<2x32xf32>
    %cst_49 = arith.constant 1.000000e+00 : f32
    %274 = vector.broadcast %cst_49 : f32 to vector<2x32xf32>
    %275 = arith.addf %274, %273 : vector<2x32xf32>
    %276 = arith.divf %274, %275 : vector<2x32xf32>
    %277 = arith.mulf %268, %250 : vector<2x32xf32>
    %278 = arith.mulf %262, %270 : vector<2x32xf32>
    %279 = arith.addf %277, %278 : vector<2x32xf32>
    %280 = math.tanh %279 : vector<2x32xf32>
    %281 = arith.mulf %276, %280 : vector<2x32xf32>
    %282 = tpu.concatenate %49, %78, %107, %136, %165, %194, %223, %252, %281 in 0 : vector<2x32xf32>, vector<2x32xf32>, vector<2x32xf32>, vector<2x32xf32>, vector<2x32xf32>, vector<2x32xf32>, vector<2x32xf32>, vector<2x32xf32>, vector<2x32xf32> -> vector<18x32xf32>
    %283 = arith.truncf %282 : vector<18x32xf32> to vector<18x32xbf16>
    %c0_50 = arith.constant 0 : index
    %c0_51 = arith.constant 0 : index
    %284 = vector.load %arg7[%c0_50, %c0_51] : memref<32x128xbf16, #tpu.memory_space<vmem>>, vector<32x128xbf16>
    %cst_52 = arith.constant dense<0.000000e+00> : vector<18x128xf32>
    %285 = tpu.matmul %283, %284, %cst_52 {dimension_numbers = #tpu.dot_dimension_numbers<[1], [0], [0], [1], [0, 0, 1, 1], [], []>} : vector<18x32xbf16>, vector<32x128xbf16>, vector<18x128xf32> -> vector<18x128xf32>
    %c0_53 = arith.constant 0 : index
    %c0_54 = arith.constant 0 : index
    %286 = vector.load %arg9[%c0_53, %c0_54] : memref<1x128xf32, #tpu.memory_space<vmem>>, vector<1x128xf32>
    %287 = vector.broadcast %286 : vector<1x128xf32> to vector<18x128xf32>
    %288 = arith.addf %285, %287 : vector<18x128xf32>
    %c0_55 = arith.constant 0 : index
    %c0_56 = arith.constant 0 : index
    %289 = vector.load %arg8[%c0_55, %c0_56] : memref<32x128xbf16, #tpu.memory_space<vmem>>, vector<32x128xbf16>
    %cst_57 = arith.constant 0.000000e+00 : f32
    %290 = vector.broadcast %cst_57 : f32 to vector<2x32xf32>
    %cst_58 = arith.constant 0.000000e+00 : f32
    %291 = vector.broadcast %cst_58 : f32 to vector<2x32xf32>
    %292 = vector.extract_strided_slice %288 {offsets = [0, 0], sizes = [2, 128], strides = [1, 1]} : vector<18x128xf32> to vector<2x128xf32>
    %293 = arith.truncf %290 : vector<2x32xf32> to vector<2x32xbf16>
    %cst_59 = arith.constant dense<0.000000e+00> : vector<2x128xf32>
    %294 = tpu.matmul %293, %289, %cst_59 {dimension_numbers = #tpu.dot_dimension_numbers<[1], [0], [0], [1], [0, 0, 1, 1], [], []>} : vector<2x32xbf16>, vector<32x128xbf16>, vector<2x128xf32> -> vector<2x128xf32>
    %295 = arith.addf %292, %294 : vector<2x128xf32>
    %296 = vector.extract_strided_slice %295 {offsets = [0, 0], sizes = [2, 32], strides = [1, 1]} : vector<2x128xf32> to vector<2x32xf32>
    %297 = arith.negf %296 : vector<2x32xf32>
    %298 = math.exp %297 : vector<2x32xf32>
    %cst_60 = arith.constant 1.000000e+00 : f32
    %299 = vector.broadcast %cst_60 : f32 to vector<2x32xf32>
    %300 = arith.addf %299, %298 : vector<2x32xf32>
    %301 = arith.divf %299, %300 : vector<2x32xf32>
    %302 = vector.extract_strided_slice %295 {offsets = [0, 32], sizes = [2, 32], strides = [1, 1]} : vector<2x128xf32> to vector<2x32xf32>
    %303 = arith.negf %302 : vector<2x32xf32>
    %304 = math.exp %303 : vector<2x32xf32>
    %cst_61 = arith.constant 1.000000e+00 : f32
    %305 = vector.broadcast %cst_61 : f32 to vector<2x32xf32>
    %306 = arith.addf %305, %304 : vector<2x32xf32>
    %307 = arith.divf %305, %306 : vector<2x32xf32>
    %308 = vector.extract_strided_slice %295 {offsets = [0, 64], sizes = [2, 32], strides = [1, 1]} : vector<2x128xf32> to vector<2x32xf32>
    %309 = math.tanh %308 : vector<2x32xf32>
    %310 = vector.extract_strided_slice %295 {offsets = [0, 96], sizes = [2, 32], strides = [1, 1]} : vector<2x128xf32> to vector<2x32xf32>
    %311 = arith.negf %310 : vector<2x32xf32>
    %312 = math.exp %311 : vector<2x32xf32>
    %cst_62 = arith.constant 1.000000e+00 : f32
    %313 = vector.broadcast %cst_62 : f32 to vector<2x32xf32>
    %314 = arith.addf %313, %312 : vector<2x32xf32>
    %315 = arith.divf %313, %314 : vector<2x32xf32>
    %316 = arith.mulf %307, %291 : vector<2x32xf32>
    %317 = arith.mulf %301, %309 : vector<2x32xf32>
    %318 = arith.addf %316, %317 : vector<2x32xf32>
    %319 = math.tanh %318 : vector<2x32xf32>
    %320 = arith.mulf %315, %319 : vector<2x32xf32>
    %321 = vector.extract_strided_slice %288 {offsets = [2, 0], sizes = [2, 128], strides = [1, 1]} : vector<18x128xf32> to vector<2x128xf32>
    %322 = arith.truncf %320 : vector<2x32xf32> to vector<2x32xbf16>
    %cst_63 = arith.constant dense<0.000000e+00> : vector<2x128xf32>
    %323 = tpu.matmul %322, %289, %cst_63 {dimension_numbers = #tpu.dot_dimension_numbers<[1], [0], [0], [1], [0, 0, 1, 1], [], []>} : vector<2x32xbf16>, vector<32x128xbf16>, vector<2x128xf32> -> vector<2x128xf32>
    %324 = arith.addf %321, %323 : vector<2x128xf32>
    %325 = vector.extract_strided_slice %324 {offsets = [0, 0], sizes = [2, 32], strides = [1, 1]} : vector<2x128xf32> to vector<2x32xf32>
    %326 = arith.negf %325 : vector<2x32xf32>
    %327 = math.exp %326 : vector<2x32xf32>
    %cst_64 = arith.constant 1.000000e+00 : f32
    %328 = vector.broadcast %cst_64 : f32 to vector<2x32xf32>
    %329 = arith.addf %328, %327 : vector<2x32xf32>
    %330 = arith.divf %328, %329 : vector<2x32xf32>
    %331 = vector.extract_strided_slice %324 {offsets = [0, 32], sizes = [2, 32], strides = [1, 1]} : vector<2x128xf32> to vector<2x32xf32>
    %332 = arith.negf %331 : vector<2x32xf32>
    %333 = math.exp %332 : vector<2x32xf32>
    %cst_65 = arith.constant 1.000000e+00 : f32
    %334 = vector.broadcast %cst_65 : f32 to vector<2x32xf32>
    %335 = arith.addf %334, %333 : vector<2x32xf32>
    %336 = arith.divf %334, %335 : vector<2x32xf32>
    %337 = vector.extract_strided_slice %324 {offsets = [0, 64], sizes = [2, 32], strides = [1, 1]} : vector<2x128xf32> to vector<2x32xf32>
    %338 = math.tanh %337 : vector<2x32xf32>
    %339 = vector.extract_strided_slice %324 {offsets = [0, 96], sizes = [2, 32], strides = [1, 1]} : vector<2x128xf32> to vector<2x32xf32>
    %340 = arith.negf %339 : vector<2x32xf32>
    %341 = math.exp %340 : vector<2x32xf32>
    %cst_66 = arith.constant 1.000000e+00 : f32
    %342 = vector.broadcast %cst_66 : f32 to vector<2x32xf32>
    %343 = arith.addf %342, %341 : vector<2x32xf32>
    %344 = arith.divf %342, %343 : vector<2x32xf32>
    %345 = arith.mulf %336, %318 : vector<2x32xf32>
    %346 = arith.mulf %330, %338 : vector<2x32xf32>
    %347 = arith.addf %345, %346 : vector<2x32xf32>
    %348 = math.tanh %347 : vector<2x32xf32>
    %349 = arith.mulf %344, %348 : vector<2x32xf32>
    %350 = vector.extract_strided_slice %288 {offsets = [4, 0], sizes = [2, 128], strides = [1, 1]} : vector<18x128xf32> to vector<2x128xf32>
    %351 = arith.truncf %349 : vector<2x32xf32> to vector<2x32xbf16>
    %cst_67 = arith.constant dense<0.000000e+00> : vector<2x128xf32>
    %352 = tpu.matmul %351, %289, %cst_67 {dimension_numbers = #tpu.dot_dimension_numbers<[1], [0], [0], [1], [0, 0, 1, 1], [], []>} : vector<2x32xbf16>, vector<32x128xbf16>, vector<2x128xf32> -> vector<2x128xf32>
    %353 = arith.addf %350, %352 : vector<2x128xf32>
    %354 = vector.extract_strided_slice %353 {offsets = [0, 0], sizes = [2, 32], strides = [1, 1]} : vector<2x128xf32> to vector<2x32xf32>
    %355 = arith.negf %354 : vector<2x32xf32>
    %356 = math.exp %355 : vector<2x32xf32>
    %cst_68 = arith.constant 1.000000e+00 : f32
    %357 = vector.broadcast %cst_68 : f32 to vector<2x32xf32>
    %358 = arith.addf %357, %356 : vector<2x32xf32>
    %359 = arith.divf %357, %358 : vector<2x32xf32>
    %360 = vector.extract_strided_slice %353 {offsets = [0, 32], sizes = [2, 32], strides = [1, 1]} : vector<2x128xf32> to vector<2x32xf32>
    %361 = arith.negf %360 : vector<2x32xf32>
    %362 = math.exp %361 : vector<2x32xf32>
    %cst_69 = arith.constant 1.000000e+00 : f32
    %363 = vector.broadcast %cst_69 : f32 to vector<2x32xf32>
    %364 = arith.addf %363, %362 : vector<2x32xf32>
    %365 = arith.divf %363, %364 : vector<2x32xf32>
    %366 = vector.extract_strided_slice %353 {offsets = [0, 64], sizes = [2, 32], strides = [1, 1]} : vector<2x128xf32> to vector<2x32xf32>
    %367 = math.tanh %366 : vector<2x32xf32>
    %368 = vector.extract_strided_slice %353 {offsets = [0, 96], sizes = [2, 32], strides = [1, 1]} : vector<2x128xf32> to vector<2x32xf32>
    %369 = arith.negf %368 : vector<2x32xf32>
    %370 = math.exp %369 : vector<2x32xf32>
    %cst_70 = arith.constant 1.000000e+00 : f32
    %371 = vector.broadcast %cst_70 : f32 to vector<2x32xf32>
    %372 = arith.addf %371, %370 : vector<2x32xf32>
    %373 = arith.divf %371, %372 : vector<2x32xf32>
    %374 = arith.mulf %365, %347 : vector<2x32xf32>
    %375 = arith.mulf %359, %367 : vector<2x32xf32>
    %376 = arith.addf %374, %375 : vector<2x32xf32>
    %377 = math.tanh %376 : vector<2x32xf32>
    %378 = arith.mulf %373, %377 : vector<2x32xf32>
    %379 = vector.extract_strided_slice %288 {offsets = [6, 0], sizes = [2, 128], strides = [1, 1]} : vector<18x128xf32> to vector<2x128xf32>
    %380 = arith.truncf %378 : vector<2x32xf32> to vector<2x32xbf16>
    %cst_71 = arith.constant dense<0.000000e+00> : vector<2x128xf32>
    %381 = tpu.matmul %380, %289, %cst_71 {dimension_numbers = #tpu.dot_dimension_numbers<[1], [0], [0], [1], [0, 0, 1, 1], [], []>} : vector<2x32xbf16>, vector<32x128xbf16>, vector<2x128xf32> -> vector<2x128xf32>
    %382 = arith.addf %379, %381 : vector<2x128xf32>
    %383 = vector.extract_strided_slice %382 {offsets = [0, 0], sizes = [2, 32], strides = [1, 1]} : vector<2x128xf32> to vector<2x32xf32>
    %384 = arith.negf %383 : vector<2x32xf32>
    %385 = math.exp %384 : vector<2x32xf32>
    %cst_72 = arith.constant 1.000000e+00 : f32
    %386 = vector.broadcast %cst_72 : f32 to vector<2x32xf32>
    %387 = arith.addf %386, %385 : vector<2x32xf32>
    %388 = arith.divf %386, %387 : vector<2x32xf32>
    %389 = vector.extract_strided_slice %382 {offsets = [0, 32], sizes = [2, 32], strides = [1, 1]} : vector<2x128xf32> to vector<2x32xf32>
    %390 = arith.negf %389 : vector<2x32xf32>
    %391 = math.exp %390 : vector<2x32xf32>
    %cst_73 = arith.constant 1.000000e+00 : f32
    %392 = vector.broadcast %cst_73 : f32 to vector<2x32xf32>
    %393 = arith.addf %392, %391 : vector<2x32xf32>
    %394 = arith.divf %392, %393 : vector<2x32xf32>
    %395 = vector.extract_strided_slice %382 {offsets = [0, 64], sizes = [2, 32], strides = [1, 1]} : vector<2x128xf32> to vector<2x32xf32>
    %396 = math.tanh %395 : vector<2x32xf32>
    %397 = vector.extract_strided_slice %382 {offsets = [0, 96], sizes = [2, 32], strides = [1, 1]} : vector<2x128xf32> to vector<2x32xf32>
    %398 = arith.negf %397 : vector<2x32xf32>
    %399 = math.exp %398 : vector<2x32xf32>
    %cst_74 = arith.constant 1.000000e+00 : f32
    %400 = vector.broadcast %cst_74 : f32 to vector<2x32xf32>
    %401 = arith.addf %400, %399 : vector<2x32xf32>
    %402 = arith.divf %400, %401 : vector<2x32xf32>
    %403 = arith.mulf %394, %376 : vector<2x32xf32>
    %404 = arith.mulf %388, %396 : vector<2x32xf32>
    %405 = arith.addf %403, %404 : vector<2x32xf32>
    %406 = math.tanh %405 : vector<2x32xf32>
    %407 = arith.mulf %402, %406 : vector<2x32xf32>
    %408 = vector.extract_strided_slice %288 {offsets = [8, 0], sizes = [2, 128], strides = [1, 1]} : vector<18x128xf32> to vector<2x128xf32>
    %409 = arith.truncf %407 : vector<2x32xf32> to vector<2x32xbf16>
    %cst_75 = arith.constant dense<0.000000e+00> : vector<2x128xf32>
    %410 = tpu.matmul %409, %289, %cst_75 {dimension_numbers = #tpu.dot_dimension_numbers<[1], [0], [0], [1], [0, 0, 1, 1], [], []>} : vector<2x32xbf16>, vector<32x128xbf16>, vector<2x128xf32> -> vector<2x128xf32>
    %411 = arith.addf %408, %410 : vector<2x128xf32>
    %412 = vector.extract_strided_slice %411 {offsets = [0, 0], sizes = [2, 32], strides = [1, 1]} : vector<2x128xf32> to vector<2x32xf32>
    %413 = arith.negf %412 : vector<2x32xf32>
    %414 = math.exp %413 : vector<2x32xf32>
    %cst_76 = arith.constant 1.000000e+00 : f32
    %415 = vector.broadcast %cst_76 : f32 to vector<2x32xf32>
    %416 = arith.addf %415, %414 : vector<2x32xf32>
    %417 = arith.divf %415, %416 : vector<2x32xf32>
    %418 = vector.extract_strided_slice %411 {offsets = [0, 32], sizes = [2, 32], strides = [1, 1]} : vector<2x128xf32> to vector<2x32xf32>
    %419 = arith.negf %418 : vector<2x32xf32>
    %420 = math.exp %419 : vector<2x32xf32>
    %cst_77 = arith.constant 1.000000e+00 : f32
    %421 = vector.broadcast %cst_77 : f32 to vector<2x32xf32>
    %422 = arith.addf %421, %420 : vector<2x32xf32>
    %423 = arith.divf %421, %422 : vector<2x32xf32>
    %424 = vector.extract_strided_slice %411 {offsets = [0, 64], sizes = [2, 32], strides = [1, 1]} : vector<2x128xf32> to vector<2x32xf32>
    %425 = math.tanh %424 : vector<2x32xf32>
    %426 = vector.extract_strided_slice %411 {offsets = [0, 96], sizes = [2, 32], strides = [1, 1]} : vector<2x128xf32> to vector<2x32xf32>
    %427 = arith.negf %426 : vector<2x32xf32>
    %428 = math.exp %427 : vector<2x32xf32>
    %cst_78 = arith.constant 1.000000e+00 : f32
    %429 = vector.broadcast %cst_78 : f32 to vector<2x32xf32>
    %430 = arith.addf %429, %428 : vector<2x32xf32>
    %431 = arith.divf %429, %430 : vector<2x32xf32>
    %432 = arith.mulf %423, %405 : vector<2x32xf32>
    %433 = arith.mulf %417, %425 : vector<2x32xf32>
    %434 = arith.addf %432, %433 : vector<2x32xf32>
    %435 = math.tanh %434 : vector<2x32xf32>
    %436 = arith.mulf %431, %435 : vector<2x32xf32>
    %437 = vector.extract_strided_slice %288 {offsets = [10, 0], sizes = [2, 128], strides = [1, 1]} : vector<18x128xf32> to vector<2x128xf32>
    %438 = arith.truncf %436 : vector<2x32xf32> to vector<2x32xbf16>
    %cst_79 = arith.constant dense<0.000000e+00> : vector<2x128xf32>
    %439 = tpu.matmul %438, %289, %cst_79 {dimension_numbers = #tpu.dot_dimension_numbers<[1], [0], [0], [1], [0, 0, 1, 1], [], []>} : vector<2x32xbf16>, vector<32x128xbf16>, vector<2x128xf32> -> vector<2x128xf32>
    %440 = arith.addf %437, %439 : vector<2x128xf32>
    %441 = vector.extract_strided_slice %440 {offsets = [0, 0], sizes = [2, 32], strides = [1, 1]} : vector<2x128xf32> to vector<2x32xf32>
    %442 = arith.negf %441 : vector<2x32xf32>
    %443 = math.exp %442 : vector<2x32xf32>
    %cst_80 = arith.constant 1.000000e+00 : f32
    %444 = vector.broadcast %cst_80 : f32 to vector<2x32xf32>
    %445 = arith.addf %444, %443 : vector<2x32xf32>
    %446 = arith.divf %444, %445 : vector<2x32xf32>
    %447 = vector.extract_strided_slice %440 {offsets = [0, 32], sizes = [2, 32], strides = [1, 1]} : vector<2x128xf32> to vector<2x32xf32>
    %448 = arith.negf %447 : vector<2x32xf32>
    %449 = math.exp %448 : vector<2x32xf32>
    %cst_81 = arith.constant 1.000000e+00 : f32
    %450 = vector.broadcast %cst_81 : f32 to vector<2x32xf32>
    %451 = arith.addf %450, %449 : vector<2x32xf32>
    %452 = arith.divf %450, %451 : vector<2x32xf32>
    %453 = vector.extract_strided_slice %440 {offsets = [0, 64], sizes = [2, 32], strides = [1, 1]} : vector<2x128xf32> to vector<2x32xf32>
    %454 = math.tanh %453 : vector<2x32xf32>
    %455 = vector.extract_strided_slice %440 {offsets = [0, 96], sizes = [2, 32], strides = [1, 1]} : vector<2x128xf32> to vector<2x32xf32>
    %456 = arith.negf %455 : vector<2x32xf32>
    %457 = math.exp %456 : vector<2x32xf32>
    %cst_82 = arith.constant 1.000000e+00 : f32
    %458 = vector.broadcast %cst_82 : f32 to vector<2x32xf32>
    %459 = arith.addf %458, %457 : vector<2x32xf32>
    %460 = arith.divf %458, %459 : vector<2x32xf32>
    %461 = arith.mulf %452, %434 : vector<2x32xf32>
    %462 = arith.mulf %446, %454 : vector<2x32xf32>
    %463 = arith.addf %461, %462 : vector<2x32xf32>
    %464 = math.tanh %463 : vector<2x32xf32>
    %465 = arith.mulf %460, %464 : vector<2x32xf32>
    %466 = vector.extract_strided_slice %288 {offsets = [12, 0], sizes = [2, 128], strides = [1, 1]} : vector<18x128xf32> to vector<2x128xf32>
    %467 = arith.truncf %465 : vector<2x32xf32> to vector<2x32xbf16>
    %cst_83 = arith.constant dense<0.000000e+00> : vector<2x128xf32>
    %468 = tpu.matmul %467, %289, %cst_83 {dimension_numbers = #tpu.dot_dimension_numbers<[1], [0], [0], [1], [0, 0, 1, 1], [], []>} : vector<2x32xbf16>, vector<32x128xbf16>, vector<2x128xf32> -> vector<2x128xf32>
    %469 = arith.addf %466, %468 : vector<2x128xf32>
    %470 = vector.extract_strided_slice %469 {offsets = [0, 0], sizes = [2, 32], strides = [1, 1]} : vector<2x128xf32> to vector<2x32xf32>
    %471 = arith.negf %470 : vector<2x32xf32>
    %472 = math.exp %471 : vector<2x32xf32>
    %cst_84 = arith.constant 1.000000e+00 : f32
    %473 = vector.broadcast %cst_84 : f32 to vector<2x32xf32>
    %474 = arith.addf %473, %472 : vector<2x32xf32>
    %475 = arith.divf %473, %474 : vector<2x32xf32>
    %476 = vector.extract_strided_slice %469 {offsets = [0, 32], sizes = [2, 32], strides = [1, 1]} : vector<2x128xf32> to vector<2x32xf32>
    %477 = arith.negf %476 : vector<2x32xf32>
    %478 = math.exp %477 : vector<2x32xf32>
    %cst_85 = arith.constant 1.000000e+00 : f32
    %479 = vector.broadcast %cst_85 : f32 to vector<2x32xf32>
    %480 = arith.addf %479, %478 : vector<2x32xf32>
    %481 = arith.divf %479, %480 : vector<2x32xf32>
    %482 = vector.extract_strided_slice %469 {offsets = [0, 64], sizes = [2, 32], strides = [1, 1]} : vector<2x128xf32> to vector<2x32xf32>
    %483 = math.tanh %482 : vector<2x32xf32>
    %484 = vector.extract_strided_slice %469 {offsets = [0, 96], sizes = [2, 32], strides = [1, 1]} : vector<2x128xf32> to vector<2x32xf32>
    %485 = arith.negf %484 : vector<2x32xf32>
    %486 = math.exp %485 : vector<2x32xf32>
    %cst_86 = arith.constant 1.000000e+00 : f32
    %487 = vector.broadcast %cst_86 : f32 to vector<2x32xf32>
    %488 = arith.addf %487, %486 : vector<2x32xf32>
    %489 = arith.divf %487, %488 : vector<2x32xf32>
    %490 = arith.mulf %481, %463 : vector<2x32xf32>
    %491 = arith.mulf %475, %483 : vector<2x32xf32>
    %492 = arith.addf %490, %491 : vector<2x32xf32>
    %493 = math.tanh %492 : vector<2x32xf32>
    %494 = arith.mulf %489, %493 : vector<2x32xf32>
    %495 = vector.extract_strided_slice %288 {offsets = [14, 0], sizes = [2, 128], strides = [1, 1]} : vector<18x128xf32> to vector<2x128xf32>
    %496 = arith.truncf %494 : vector<2x32xf32> to vector<2x32xbf16>
    %cst_87 = arith.constant dense<0.000000e+00> : vector<2x128xf32>
    %497 = tpu.matmul %496, %289, %cst_87 {dimension_numbers = #tpu.dot_dimension_numbers<[1], [0], [0], [1], [0, 0, 1, 1], [], []>} : vector<2x32xbf16>, vector<32x128xbf16>, vector<2x128xf32> -> vector<2x128xf32>
    %498 = arith.addf %495, %497 : vector<2x128xf32>
    %499 = vector.extract_strided_slice %498 {offsets = [0, 0], sizes = [2, 32], strides = [1, 1]} : vector<2x128xf32> to vector<2x32xf32>
    %500 = arith.negf %499 : vector<2x32xf32>
    %501 = math.exp %500 : vector<2x32xf32>
    %cst_88 = arith.constant 1.000000e+00 : f32
    %502 = vector.broadcast %cst_88 : f32 to vector<2x32xf32>
    %503 = arith.addf %502, %501 : vector<2x32xf32>
    %504 = arith.divf %502, %503 : vector<2x32xf32>
    %505 = vector.extract_strided_slice %498 {offsets = [0, 32], sizes = [2, 32], strides = [1, 1]} : vector<2x128xf32> to vector<2x32xf32>
    %506 = arith.negf %505 : vector<2x32xf32>
    %507 = math.exp %506 : vector<2x32xf32>
    %cst_89 = arith.constant 1.000000e+00 : f32
    %508 = vector.broadcast %cst_89 : f32 to vector<2x32xf32>
    %509 = arith.addf %508, %507 : vector<2x32xf32>
    %510 = arith.divf %508, %509 : vector<2x32xf32>
    %511 = vector.extract_strided_slice %498 {offsets = [0, 64], sizes = [2, 32], strides = [1, 1]} : vector<2x128xf32> to vector<2x32xf32>
    %512 = math.tanh %511 : vector<2x32xf32>
    %513 = vector.extract_strided_slice %498 {offsets = [0, 96], sizes = [2, 32], strides = [1, 1]} : vector<2x128xf32> to vector<2x32xf32>
    %514 = arith.negf %513 : vector<2x32xf32>
    %515 = math.exp %514 : vector<2x32xf32>
    %cst_90 = arith.constant 1.000000e+00 : f32
    %516 = vector.broadcast %cst_90 : f32 to vector<2x32xf32>
    %517 = arith.addf %516, %515 : vector<2x32xf32>
    %518 = arith.divf %516, %517 : vector<2x32xf32>
    %519 = arith.mulf %510, %492 : vector<2x32xf32>
    %520 = arith.mulf %504, %512 : vector<2x32xf32>
    %521 = arith.addf %519, %520 : vector<2x32xf32>
    %522 = math.tanh %521 : vector<2x32xf32>
    %523 = arith.mulf %518, %522 : vector<2x32xf32>
    %524 = vector.extract_strided_slice %288 {offsets = [16, 0], sizes = [2, 128], strides = [1, 1]} : vector<18x128xf32> to vector<2x128xf32>
    %525 = arith.truncf %523 : vector<2x32xf32> to vector<2x32xbf16>
    %cst_91 = arith.constant dense<0.000000e+00> : vector<2x128xf32>
    %526 = tpu.matmul %525, %289, %cst_91 {dimension_numbers = #tpu.dot_dimension_numbers<[1], [0], [0], [1], [0, 0, 1, 1], [], []>} : vector<2x32xbf16>, vector<32x128xbf16>, vector<2x128xf32> -> vector<2x128xf32>
    %527 = arith.addf %524, %526 : vector<2x128xf32>
    %528 = vector.extract_strided_slice %527 {offsets = [0, 0], sizes = [2, 32], strides = [1, 1]} : vector<2x128xf32> to vector<2x32xf32>
    %529 = arith.negf %528 : vector<2x32xf32>
    %530 = math.exp %529 : vector<2x32xf32>
    %cst_92 = arith.constant 1.000000e+00 : f32
    %531 = vector.broadcast %cst_92 : f32 to vector<2x32xf32>
    %532 = arith.addf %531, %530 : vector<2x32xf32>
    %533 = arith.divf %531, %532 : vector<2x32xf32>
    %534 = vector.extract_strided_slice %527 {offsets = [0, 32], sizes = [2, 32], strides = [1, 1]} : vector<2x128xf32> to vector<2x32xf32>
    %535 = arith.negf %534 : vector<2x32xf32>
    %536 = math.exp %535 : vector<2x32xf32>
    %cst_93 = arith.constant 1.000000e+00 : f32
    %537 = vector.broadcast %cst_93 : f32 to vector<2x32xf32>
    %538 = arith.addf %537, %536 : vector<2x32xf32>
    %539 = arith.divf %537, %538 : vector<2x32xf32>
    %540 = vector.extract_strided_slice %527 {offsets = [0, 64], sizes = [2, 32], strides = [1, 1]} : vector<2x128xf32> to vector<2x32xf32>
    %541 = math.tanh %540 : vector<2x32xf32>
    %542 = vector.extract_strided_slice %527 {offsets = [0, 96], sizes = [2, 32], strides = [1, 1]} : vector<2x128xf32> to vector<2x32xf32>
    %543 = arith.negf %542 : vector<2x32xf32>
    %544 = math.exp %543 : vector<2x32xf32>
    %cst_94 = arith.constant 1.000000e+00 : f32
    %545 = vector.broadcast %cst_94 : f32 to vector<2x32xf32>
    %546 = arith.addf %545, %544 : vector<2x32xf32>
    %547 = arith.divf %545, %546 : vector<2x32xf32>
    %548 = arith.mulf %539, %521 : vector<2x32xf32>
    %549 = arith.mulf %533, %541 : vector<2x32xf32>
    %550 = arith.addf %548, %549 : vector<2x32xf32>
    %551 = math.tanh %550 : vector<2x32xf32>
    %552 = arith.mulf %547, %551 : vector<2x32xf32>
    %553 = tpu.concatenate %320, %349, %378, %407, %436, %465, %494, %523, %552 in 0 : vector<2x32xf32>, vector<2x32xf32>, vector<2x32xf32>, vector<2x32xf32>, vector<2x32xf32>, vector<2x32xf32>, vector<2x32xf32>, vector<2x32xf32>, vector<2x32xf32> -> vector<18x32xf32>
    %554 = arith.truncf %553 : vector<18x32xf32> to vector<18x32xbf16>
    %c0_95 = arith.constant 0 : index
    %c0_96 = arith.constant 0 : index
    %555 = vector.load %arg10[%c0_95, %c0_96] : memref<32x128xbf16, #tpu.memory_space<vmem>>, vector<32x128xbf16>
    %cst_97 = arith.constant dense<0.000000e+00> : vector<18x128xf32>
    %556 = tpu.matmul %554, %555, %cst_97 {dimension_numbers = #tpu.dot_dimension_numbers<[1], [0], [0], [1], [0, 0, 1, 1], [], []>} : vector<18x32xbf16>, vector<32x128xbf16>, vector<18x128xf32> -> vector<18x128xf32>
    %c0_98 = arith.constant 0 : index
    %c0_99 = arith.constant 0 : index
    %557 = vector.load %arg11[%c0_98, %c0_99] : memref<1x128xf32, #tpu.memory_space<vmem>>, vector<1x128xf32>
    %558 = vector.broadcast %557 : vector<1x128xf32> to vector<18x128xf32>
    %559 = arith.addf %556, %558 : vector<18x128xf32>
    %c0_100 = arith.constant 0 : index
    %c0_101 = arith.constant 0 : index
    %560 = vector.load %arg12[%c0_100, %c0_101] : memref<18x128xf32, #tpu.memory_space<vmem>>, vector<18x128xf32>
    tpu.vector_store %arg12[%c0_100, %c0_101], %559 {strides = array<i32>} : memref<18x128xf32, #tpu.memory_space<vmem>>, vector<18x128xf32>,
    return
  }
  func.func @transform_0(%arg0: i32) -> (i32, i32) {
    %c0_i32 = arith.constant 0 : i32
    %c0_i32_0 = arith.constant 0 : i32
    %c0_i32_1 = arith.constant 0 : i32
    return %c0_i32, %c0_i32_0 : i32, i32
  }
  func.func @transform_1(%arg0: i32) -> (i32, i32) {
    %c0_i32 = arith.constant 0 : i32
    %c0_i32_0 = arith.constant 0 : i32
    %c0_i32_1 = arith.constant 0 : i32
    return %c0_i32, %c0_i32_0 : i32, i32
  }
  func.func @transform_2(%arg0: i32) -> (i32, i32) {
    %c0_i32 = arith.constant 0 : i32
    %c0_i32_0 = arith.constant 0 : i32
    %c0_i32_1 = arith.constant 0 : i32
    return %c0_i32, %c0_i32_0 : i32, i32
  }
  func.func @transform_3(%arg0: i32) -> (i32, i32) {
    %c0_i32 = arith.constant 0 : i32
    %c0_i32_0 = arith.constant 0 : i32
    %c0_i32_1 = arith.constant 0 : i32
    return %c0_i32, %c0_i32_0 : i32, i32
  }
  func.func @transform_4(%arg0: i32) -> (i32, i32) {
    %c0_i32 = arith.constant 0 : i32
    %c0_i32_0 = arith.constant 0 : i32
    %c0_i32_1 = arith.constant 0 : i32
    return %c0_i32, %c0_i32_0 : i32, i32
  }
  func.func @transform_5(%arg0: i32) -> (i32, i32) {
    %c0_i32 = arith.constant 0 : i32
    %c0_i32_0 = arith.constant 0 : i32
    %c0_i32_1 = arith.constant 0 : i32
    return %c0_i32, %c0_i32_0 : i32, i32
  }
  func.func @transform_6(%arg0: i32) -> (i32, i32) {
    %c0_i32 = arith.constant 0 : i32
    %c0_i32_0 = arith.constant 0 : i32
    %c0_i32_1 = arith.constant 0 : i32
    return %c0_i32, %c0_i32_0 : i32, i32
  }
  func.func @transform_7(%arg0: i32) -> (i32, i32) {
    %c0_i32 = arith.constant 0 : i32
    %c0_i32_0 = arith.constant 0 : i32
    %c0_i32_1 = arith.constant 0 : i32
    return %c0_i32, %c0_i32_0 : i32, i32
  }
  func.func @transform_8(%arg0: i32) -> (i32, i32) {
    %c0_i32 = arith.constant 0 : i32
    %c0_i32_0 = arith.constant 0 : i32
    %c0_i32_1 = arith.constant 0 : i32
    return %c0_i32, %c0_i32_0 : i32, i32
  }
  func.func @transform_9(%arg0: i32) -> (i32, i32) {
    %c0_i32 = arith.constant 0 : i32
    %c0_i32_0 = arith.constant 0 : i32
    %c0_i32_1 = arith.constant 0 : i32
    return %c0_i32, %c0_i32_0 : i32, i32
  }
  func.func @transform_10(%arg0: i32) -> (i32, i32) {
    %c0_i32 = arith.constant 0 : i32
    %c0_i32_0 = arith.constant 0 : i32
    %c0_i32_1 = arith.constant 0 : i32
    return %c0_i32, %c0_i32_0 : i32, i32
  }
  func.func @transform_11(%arg0: i32) -> (i32, i32) {
    %c0_i32 = arith.constant 0 : i32
    %c0_i32_0 = arith.constant 0 : i32
    %c0_i32_1 = arith.constant 0 : i32
    return %c0_i32, %c0_i32_0 : i32, i32
  }
}

</mosaic_0001>

<bundles_post_ra>
// kernel: tpu_custom_call.1
= control target key start
LH: loop header
LB: loop body
LE: loop exit
PB: predicated region body
PF: predicated region fallthrough
CT: control target
= control target key end

     0   :  { %v2394_v1 = vmov 0   ;;  %v2395_v2 = vmov 0.0   ;;  %vm2396_vm0 = vmmov 0   ;;  %s2842_s0 = inlined_call_operand.vmem [shape: s32[16,1], index: 0, kind: input, shape index: {}]   ;;  %s2843_s1 = inlined_call_operand.vmem [shape: bf16[2,32], index: 1, kind: input, shape index: {}]   ;;  %s2844_s2 = inlined_call_operand.vmem [shape: bf16[128,32], index: 2, kind: input, shape index: {}]   ;;  %s2845_s3 = inlined_call_operand.vmem [shape: bf16[32,128], index: 3, kind: input, shape index: {}]   ;;  %s2846_s4 = inlined_call_operand.vmem [shape: bf16[32,128], index: 4, kind: input, shape index: {}]   ;;  %s2847_s5 = inlined_call_operand.vmem [shape: f32[1,128], index: 5, kind: input, shape index: {}]   ;;  %s2848_s6 = inlined_call_operand.vmem [shape: bf16[32,128], index: 6, kind: input, shape index: {}]   ;;  %s2849_s7 = inlined_call_operand.vmem [shape: bf16[32,128], index: 7, kind: input, shape index: {}]   ;;  %s2850_s8 = inlined_call_operand.vmem [shape: f32[1,128], index: 8, kind: input, shape index: {}]   ;;  %s2851_s9 = inlined_call_operand.vmem [shape: bf16[32,128], index: 9, kind: input, shape index: {}]   ;;  %s2852_s10 = inlined_call_operand.vmem [shape: f32[1,128], index: 10, kind: input, shape index: {}]   ;;  %s2853_s11 = inlined_call_operand.hbm [shape: f32[18,128], index: 11, kind: output, shape index: {}]  }
   0x1   :  { %v40_v0 = vld [vmem:[%s2842_s0] sm:$0xff]  ;;  %2207 = vset.pattern.permute.xlu0 %v2394_v1  ;;  %2010 = vmatprep.subr.bf16.mxu0 %v2395_v2  ;;  %v41_v4 = vld [vmem:[%s2842_s0 + $0x8] sm:$0xff]  ;;  %v2210_v6 = vld [vmem:[%s2844_s2 + $0x10] sm:$0xff]  }
   0x2   :  { %v2208_v3 = vld [vmem:[%s2844_s2] sm:$0xff]   ;;  %45 = vperm.xlu0 %2207, %v40_v0   ;;  %v2209_v5 = vld [vmem:[%s2844_s2 + $0x8] sm:$0xff]   ;;  %2026 = vmatprep.mubr.msk.bf16.mxu0 %vm2396_vm0, %v2395_v2  ;;  %v2211_v7 = vld [vmem:[%s2844_s2 + $0x18] sm:$0xff]  }
   0x3   :  { %2011 = vmatpush3.bf16.msra.mxu0 %v2208_v3  ;;  %v2212_v8 = vld [vmem:[%s2844_s2 + $0x20] sm:$0xff]  }
   0x4   :  { %2012 = vmatprep.subr.bf16.mxu0 %v2395_v2 }
   0x6   :  { %48 = vperm.xlu0 %2207, %v41_v4  }
   0x7   :  { %2013 = vmatpush3.bf16.msra.mxu0 %v2209_v5 }
   0x8   :  { %2014 = vmatprep.subr.bf16.mxu0 %v2395_v2 }
   0xb   :  { %2015 = vmatpush3.bf16.msra.mxu0 %v2210_v6 }
   0xc   :  { %2016 = vmatprep.subr.bf16.mxu0 %v2395_v2 }
   0xf   :  { %2017 = vmatpush3.bf16.msra.mxu0 %v2211_v7 }
  0x10   :  { %16 = vsyncpa [#allocation3], 0  ;;  %2018 = vmatprep.subr.bf16.mxu0 %v2395_v2  ;;  %v2213_v9 = vld [vmem:[%s2844_s2 + $0x28] sm:$0xff]   ;;  %v2214_v10 = vld [vmem:[%s2844_s2 + $0x30] sm:$0xff]   ;;  %v42_v12 = vlaneseq  ;;  %v2397_v16 = vmov 1.0|1.0  }
  0x11   :  { %v2215_v11 = vld [vmem:[%s2844_s2 + $0x38] sm:$0xff]   ;;  %v2216_v17 = vld [vmem:[%s2845_s3] sm:$0xff]   ;;  %v2217_v18 = vld [vmem:[%s2845_s3 + $0x8] sm:$0xff]   ;;  %vm166_vm4 = vcmask 1041408   ;;  %vm199_vm5 = vcmask 261120   ;;  %s2398_s25 = smov 64  }
  0x12   :  { %v43_v14 = vand.u32 127, %v42_v12  ;;  %2030 = vmatprep.subr.bf16.mxu1 %v2216_v17  ;;  %v2517_v19 = vld [vmem:[%s2846_s4] sm:$0xff]   ;;  %v2524_v20 = vld [vmem:[%s2846_s4 + $0x8] sm:$0xff]   ;;  %vm963_vm6 = vcmask 1043456   ;;  %vm965_vm7 = vcmask 1045504  }
  0x13   :  { %2019 = vmatpush3.bf16.msra.mxu0 %v2212_v8  ;;  %2031 = vmatpush3.bf16.msra.mxu1 %v2216_v17  ;;  %v162_v21 = vld [vmem:[%s2843_s1] sm:$0x1] }
  0x14   :  { %2020 = vmatprep.subr.bf16.mxu0 %v2395_v2  ;;  %2032 = vmatprep.subr.bf16.mxu1 %v2217_v18  ;;  %v163_v25 = vunpack.c.l.bf16 %v162_v21  ;;  %v1882_v33 = vld [vmem:[%s2847_s5] ss:$0 sm:$0xff]  ;;  %s2399_s5 = smov 32  }
  0x17   :  { %2021 = vmatpush3.bf16.msra.mxu0 %v2213_v9  ;;  %2033 = vmatpush3.bf16.msra.mxu1 %v2217_v18 }
  0x18   :  { %2022 = vmatprep.subr.bf16.mxu0 %v2395_v2  ;;  %2038 = vmatprep.subr.bf16.mxu1 %v2395_v2 }
  0x1b   :  { %2023 = vmatpush3.bf16.msra.mxu0 %v2214_v10 }
  0x1c   :  { %2024 = vmatprep.subr.bf16.mxu0 %v2395_v2 }
  0x1f   :  { %2025 = vmatpush3.bf16.msra.mxu0 %v2215_v11 }
  0x20   :  { %2062 = vmatprep.subr.bf16.mxu0 %v2395_v2 }
  0x81   :  { %v46_v13 = vpop.permute.xlu0 %45 }
  0x82   :  { %vm50_vm1 = vcmp.eq.s32.totalorder %v43_v14, %v46_v13 }
  0x85   :  { %v49_v15 = vpop.permute.xlu0 %48 }
  0x86   :  { %vm51_vm2 = vcmp.eq.s32.totalorder %v43_v14, %v49_v15 }
  0x87   :  { %vm1880_vm3 = vmpackc.low %vm51_vm2, %vm50_vm1 }
  0x88   :  { %2027 = vmatmul.mubr.msk.bf16.vlgmr.msra.gmra.mrb[0].mxu0 %vm1880_vm3, %v2397_v16 }
  0x89   :  { %2066 = vmatprep.mubr.msk.bf16.mxu0 %vm2396_vm0, %v2395_v2  ;;  %2063 = vmatpush3.bf16.msra.mxu0 %v2517_v19 }
  0x8a   :  { %2064 = vmatprep.subr.bf16.mxu0 %v2395_v2 }
  0x8d   :  { %2065 = vmatpush3.bf16.msra.mxu0 %v2524_v20 }
  0x8e   :  { %2078 = vmatprep.subr.bf16.mxu0 %v2395_v2 }
 0x15b   :  { %v155_v22 = vpop.f32.mrb[0].mxu0 }
 0x15c   :  { %v167_v23 = vrot.slane %v155_v22, 6  ;;  %v2028_v24 = vpop.f32.mrb[1].mxu0 }
 0x15d   :  { %v158_v26 = vpop.f32.mrb[2].mxu0 }
 0x15e   :  { %v168_v27 = vrot.slane %v158_v26, 6  ;;  %v2029_v28 = vpop.f32.mrb[3].mxu0  ;;  %v173_v30 = vsel %vm166_vm4, %v163_v25, %v167_v23 }
 0x160   :  { %v169_v29 = vsel %vm166_vm4, %v167_v23, %v168_v27  ;;  %v175_v32 = vpack.c.bf16 %v168_v27, %v168_v27 }
 0x161   :  { %v174_v31 = vpack.c.bf16 %v169_v29, %v173_v30 }
 0x163   :  { %2034 = vmatprep.mubr.msk.bf16.mxu1 %vm199_vm5, %v174_v31 }
 0x164   :  { %2035 = vmatmul.mubr.msk.bf16.vlgmr.msra.gmra.mrb[0].mxu1 %vm199_vm5, %v175_v32 }
 0x165   :  { %2039 = vmatpush3.bf16.msra.mxu1 %v2517_v19  ;;  %2042 = vmatprep.mubr.msk.bf16.mxu1 %vm2396_vm0, %v2395_v2 }
 0x166   :  { %2040 = vmatprep.subr.bf16.mxu1 %v2395_v2 }
 0x169   :  { %2041 = vmatpush3.bf16.msra.mxu1 %v2524_v20 }
 0x16a   :  { %2046 = vmatprep.subr.bf16.mxu1 %v2395_v2 }
 0x16c   :  { %2043 = vmatmul.mubr.bf16.vlgmr.msra.gmra.mrb[4].mxu1 %v2394_v1 }
 0x16d   :  { %2047 = vmatpush3.bf16.msra.mxu1 %v2517_v19  ;;  %2050 = vmatprep.mubr.msk.bf16.mxu1 %vm2396_vm0, %v2395_v2 }
 0x16e   :  { %2048 = vmatprep.subr.bf16.mxu1 %v2395_v2 }
 0x171   :  { %2049 = vmatpush3.bf16.msra.mxu1 %v2524_v20 }
 0x172   :  { %2054 = vmatprep.subr.bf16.mxu1 %v2395_v2 }
 0x237   :  { %v2036_v34 = vpop.f32.mrb[0].mxu1 }
 0x238   :  { %v2551_v35 = vadd.f32 %v2036_v34, %v1882_v33  ;;  %v240_v36 = vpop.f32.mrb[1].mxu1 }
 0x239   :  { %v2037_v37 = vpop.f32.mrb[2].mxu1  ;;  %v2555_v40 = vadd.f32 %v1882_v33, %v240_v36 }
 0x23a   :  { %v243_v38 = vpop.f32.mrb[3].mxu1 }
 0x23b   :  { %v2553_v39 = vadd.f32 %v1882_v33, %v243_v38 }
 0x23f   :  { %v307_v41 = vpop.f32.mrb[4].mxu1 }
 0x240   :  { %v313_v42 = vadd.f32 %v307_v41, %v2555_v40  ;;  %v2044_v43 = vpop.f32.mrb[5].mxu1 }
 0x241   :  { %v310_v44 = vpop.f32.mrb[6].mxu1 }
 0x242   :  { %2226 = vtanh.f32 %v313_v42  ;;  %v2045_v45 = vpop.f32.mrb[7].mxu1  ;;  %v1889_v47 = vmul.f32 -1.442695, %v313_v42 }
 0x244   :  { %2228 = vpow2.f32 %v1889_v47 }
 0x24c   :  { %v2227_v46 = vpop.eup %2226 }
 0x24d   :  { %323 = vrot.lane.b32.xlu1 %v2227_v46, %s2398_s25 }
 0x24e   :  { %v2229_v48 = vpop.eup %2228 }
 0x24f   :  { %v317_v49 = vadd.f32 1.0, %v2229_v48 }
 0x251   :  { %2230 = vrcp.f32 %v317_v49 }
 0x25b   :  { %v2231_v50 = vpop.eup %2230 }
 0x25c   :  { %v321_v53 = vmul.f32 0.0, %v2231_v50 }
 0x2bf   :  { %v324_v51 = vpop.permute.xlu1 %323 }
 0x2c0   :  { %v326_v52 = vmul.f32 %v2231_v50, %v324_v51 }
 0x2c2   :  { %328 = vrot.lane.b32.xlu1 %v326_v52, %s2399_s5 }
 0x334   :  { %v329_v54 = vpop.permute.xlu1 %328 }
 0x335   :  { %v331_v55 = vadd.f32 %v329_v54, %v321_v53 }
 0x337   :  { %2232 = vtanh.f32 %v331_v55  ;;  %v397_v12 = vrot.slane %v331_v55, 6 }
 0x341   :  { %v2233_v56 = vpop.eup %2232 }
 0x342   :  { %334 = vrot.lane.b32.xlu0 %v2233_v56, %s2398_s25 }
 0x3b4   :  { %v335_v57 = vpop.permute.xlu0 %334 }
 0x3b5   :  { %v2561_v58 = vmul.f32 %v2231_v50, %v335_v57 }
 0x3b7   :  { %v338_v59 = vpack.c.bf16 %v2561_v58, %v2561_v58 }
 0x3b9   :  { %340 = vrot.lane.b32.xlu1 %v338_v59, %s2399_s5 }
 0x42b   :  { %v341_v60 = vpop.permute.xlu1 %340 }
 0x42c   :  { %2051 = vmatmul.mubr.msk.bf16.vlgmr.msra.gmra.mrb[8].mxu1 %vm199_vm5, %v341_v60 }
 0x42d   :  { %2055 = vmatpush3.bf16.msra.mxu1 %v2517_v19  ;;  %2058 = vmatprep.mubr.msk.bf16.mxu1 %vm2396_vm0, %v2395_v2 }
 0x42e   :  { %2056 = vmatprep.subr.bf16.mxu1 %v2395_v2 }
 0x431   :  { %2057 = vmatpush3.bf16.msra.mxu1 %v2524_v20 }
 0x432   :  { %2070 = vmatprep.subr.bf16.mxu1 %v2395_v2 }
 0x4ff   :  { %v379_v61 = vpop.f32.mrb[8].mxu1 }
 0x500   :  { %v386_v62 = vrot.slane %v379_v61, 6  ;;  %v2052_v63 = vpop.f32.mrb[9].mxu1 }
 0x501   :  { %v382_v0 = vpop.f32.mrb[10].mxu1 }
 0x502   :  { %v388_v3 = vadd.f32 %v386_v62, %v2555_v40  ;;  %v2053_v4 = vpop.f32.mrb[11].mxu1 }
 0x504   :  { %2234 = vtanh.f32 %v388_v3  ;;  %v1891_v6 = vmul.f32 -1.442695, %v388_v3 }
 0x506   :  { %2236 = vpow2.f32 %v1891_v6 }
 0x50e   :  { %v2235_v5 = vpop.eup %2234 }
 0x50f   :  { %401 = vrot.lane.b32.xlu0 %v2235_v5, %s2398_s25 }
 0x510   :  { %v2237_v7 = vpop.eup %2236 }
 0x511   :  { %v392_v8 = vadd.f32 1.0, %v2237_v7 }
 0x513   :  { %2238 = vrcp.f32 %v392_v8 }
 0x51d   :  { %v2239_v9 = vpop.eup %2238 }
 0x51e   :  { %v399_v13 = vmul.f32 %v2239_v9, %v397_v12 }
 0x581   :  { %v402_v10 = vpop.permute.xlu0 %401 }
 0x582   :  { %v404_v11 = vmul.f32 %v2239_v9, %v402_v10 }
 0x584   :  { %406 = vrot.lane.b32.xlu1 %v404_v11, %s2399_s5 }
 0x5f6   :  { %v407_v14 = vpop.permute.xlu1 %406 }
 0x5f7   :  { %v409_v15 = vadd.f32 %v407_v14, %v399_v13 }
 0x5f9   :  { %2240 = vtanh.f32 %v409_v15  ;;  %v476_v38 = vrot.slane %v409_v15, 6 }
 0x603   :  { %v2241_v16 = vpop.eup %2240 }
 0x604   :  { %412 = vrot.lane.b32.xlu0 %v2241_v16, %s2398_s25 }
 0x676   :  { %v413_v17 = vpop.permute.xlu0 %412 }
 0x677   :  { %v415_v18 = vmul.f32 %v2239_v9, %v413_v17 }
 0x679   :  { %v416_v21 = vpack.c.bf16 %v415_v18, %v415_v18  ;;  %v962_v47 = vsel %vm166_vm4, %v2561_v58, %v415_v18 }
 0x67b   :  { %v418_v22 = vrot.slane %v416_v21, 1 }
 0x67d   :  { %419 = vrot.lane.b32.xlu1 %v418_v22, %s2399_s5 }
 0x6ef   :  { %v420_v23 = vpop.permute.xlu1 %419 }
 0x6f0   :  { %2059 = vmatmul.mubr.msk.bf16.vlgmr.msra.gmra.mrb[12].mxu1 %vm199_vm5, %v420_v23 }
 0x6f1   :  { %2071 = vmatpush3.bf16.msra.mxu1 %v2517_v19  ;;  %2074 = vmatprep.mubr.msk.bf16.mxu1 %vm2396_vm0, %v2395_v2 }
 0x6f2   :  { %2072 = vmatprep.subr.bf16.mxu1 %v2395_v2 }
 0x6f5   :  { %2073 = vmatpush3.bf16.msra.mxu1 %v2524_v20 }
 0x6f6   :  { %2086 = vmatprep.subr.bf16.mxu1 %v2395_v2 }
 0x7c3   :  { %v458_v24 = vpop.f32.mrb[12].mxu1 }
 0x7c4   :  { %v465_v25 = vrot.slane %v458_v24, 4  ;;  %v2060_v26 = vpop.f32.mrb[13].mxu1 }
 0x7c5   :  { %v461_v27 = vpop.f32.mrb[14].mxu1 }
 0x7c6   :  { %v467_v28 = vadd.f32 %v465_v25, %v2555_v40  ;;  %v2061_v29 = vpop.f32.mrb[15].mxu1 }
 0x7c8   :  { %2242 = vtanh.f32 %v467_v28  ;;  %v1893_v31 = vmul.f32 -1.442695, %v467_v28 }
 0x7ca   :  { %2244 = vpow2.f32 %v1893_v31 }
 0x7d2   :  { %v2243_v30 = vpop.eup %2242 }
 0x7d3   :  { %480 = vrot.lane.b32.xlu0 %v2243_v30, %s2398_s25 }
 0x7d4   :  { %v2245_v32 = vpop.eup %2244 }
 0x7d5   :  { %v471_v33 = vadd.f32 1.0, %v2245_v32 }
 0x7d7   :  { %2246 = vrcp.f32 %v471_v33 }
 0x7e1   :  { %v2247_v34 = vpop.eup %2246 }
 0x7e2   :  { %v478_v41 = vmul.f32 %v2247_v34, %v476_v38 }
 0x845   :  { %v481_v36 = vpop.permute.xlu0 %480 }
 0x846   :  { %v483_v37 = vmul.f32 %v2247_v34, %v481_v36 }
 0x848   :  { %485 = vrot.lane.b32.xlu1 %v483_v37, %s2399_s5 }
 0x8ba   :  { %v486_v42 = vpop.permute.xlu1 %485 }
 0x8bb   :  { %v488_v43 = vadd.f32 %v486_v42, %v478_v41 }
 0x8bd   :  { %2248 = vtanh.f32 %v488_v43  ;;  %v555_v3 = vrot.slane %v488_v43, 6 }
 0x8c7   :  { %v2249_v44 = vpop.eup %2248 }
 0x8c8   :  { %491 = vrot.lane.b32.xlu0 %v2249_v44, %s2398_s25 }
 0x93a   :  { %v492_v45 = vpop.permute.xlu0 %491 }
 0x93b   :  { %v494_v46 = vmul.f32 %v2247_v34, %v492_v45 }
 0x93d   :  { %v495_v48 = vpack.c.bf16 %v494_v46, %v494_v46  ;;  %v964_v49 = vsel %vm963_vm6, %v962_v47, %v494_v46 }
 0x93f   :  { %v497_v50 = vrot.slane %v495_v48, 2 }
 0x941   :  { %498 = vrot.lane.b32.xlu1 %v497_v50, %s2399_s5 }
 0x9b3   :  { %v499_v51 = vpop.permute.xlu1 %498 }
 0x9b4   :  { %2067 = vmatmul.mubr.msk.bf16.vlgmr.msra.gmra.mrb[4].mxu0 %vm199_vm5, %v499_v51 }
 0x9b5   :  { %2079 = vmatpush3.bf16.msra.mxu0 %v2517_v19  ;;  %2082 = vmatprep.mubr.msk.bf16.mxu0 %vm2396_vm0, %v2395_v2 }
 0x9b6   :  { %2080 = vmatprep.subr.bf16.mxu0 %v2395_v2 }
 0x9b9   :  { %2081 = vmatpush3.bf16.msra.mxu0 %v2524_v20 }
 0x9ba   :  { %2094 = vmatprep.subr.bf16.mxu0 %v2395_v2 }
 0xa87   :  { %v537_v52 = vpop.f32.mrb[4].mxu0 }
 0xa88   :  { %v544_v53 = vrot.slane %v537_v52, 2  ;;  %v2068_v54 = vpop.f32.mrb[5].mxu0 }
 0xa89   :  { %v540_v55 = vpop.f32.mrb[6].mxu0 }
 0xa8a   :  { %v546_v56 = vadd.f32 %v544_v53, %v2555_v40  ;;  %v2069_v57 = vpop.f32.mrb[7].mxu0 }
 0xa8c   :  { %2250 = vtanh.f32 %v546_v56  ;;  %v1895_v59 = vmul.f32 -1.442695, %v546_v56 }
 0xa8e   :  { %2252 = vpow2.f32 %v1895_v59 }
 0xa96   :  { %v2251_v58 = vpop.eup %2250 }
 0xa97   :  { %559 = vrot.lane.b32.xlu0 %v2251_v58, %s2398_s25 }
 0xa98   :  { %v2253_v60 = vpop.eup %2252 }
 0xa99   :  { %v550_v61 = vadd.f32 1.0, %v2253_v60 }
 0xa9b   :  { %2254 = vrcp.f32 %v550_v61 }
 0xaa5   :  { %v2255_v62 = vpop.eup %2254 }
 0xaa6   :  { %v557_v4 = vmul.f32 %v2255_v62, %v555_v3 }
 0xb09   :  { %v560_v63 = vpop.permute.xlu0 %559 }
 0xb0a   :  { %v562_v0 = vmul.f32 %v2255_v62, %v560_v63 }
 0xb0c   :  { %564 = vrot.lane.b32.xlu1 %v562_v0, %s2399_s5 }
 0xb7e   :  { %v565_v5 = vpop.permute.xlu1 %564 }
 0xb7f   :  { %v567_v6 = vadd.f32 %v565_v5, %v557_v4 }
 0xb81   :  { %2256 = vtanh.f32 %v567_v6  ;;  %v631_v27 = vrot.slane %v567_v6, 6 }
 0xb8b   :  { %v2257_v40 = vpop.eup %2256 }
 0xb8c   :  { %570 = vrot.lane.b32.xlu0 %v2257_v40, %s2398_s25 }
 0xbfe   :  { %v571_v7 = vpop.permute.xlu0 %570 }
 0xbff   :  { %v573_v8 = vmul.f32 %v2255_v62, %v571_v7 }
 0xc01   :  { %v574_v9 = vpack.c.bf16 %v573_v8, %v573_v8  ;;  %v2605_v10 = vsel %vm965_vm7, %v964_v49, %v573_v8 }
 0xc03   :  { %v576_v11 = vrot.slane %v574_v9, 3 }
 0xc05   :  { %577 = vrot.lane.b32.xlu1 %v576_v11, %s2399_s5 }
 0xc77   :  { %v578_v12 = vpop.permute.xlu1 %577 }
 0xc78   :  { %2075 = vmatmul.mubr.msk.bf16.vlgmr.msra.gmra.mrb[16].mxu1 %vm199_vm5, %v578_v12 }
 0xc79   :  { %2087 = vmatpush3.bf16.msra.mxu1 %v2517_v19  ;;  %2090 = vmatprep.mubr.msk.bf16.mxu1 %vm2396_vm0, %v2395_v2 }
 0xc7a   :  { %2088 = vmatprep.subr.bf16.mxu1 %v2395_v2 }
 0xc7d   :  { %2089 = vmatpush3.bf16.msra.mxu1 %v2524_v20 }
 0xc7e   :  { %2102 = vmatprep.subr.bf16.mxu1 %v2395_v2 }
 0xd4b   :  { %v616_v13 = vpop.f32.mrb[16].mxu1 }
 0xd4c   :  { %v622_v14 = vadd.f32 %v616_v13, %v2553_v39  ;;  %v2076_v15 = vpop.f32.mrb[17].mxu1 }
 0xd4d   :  { %v619_v16 = vpop.f32.mrb[18].mxu1 }
 0xd4e   :  { %2258 = vtanh.f32 %v622_v14  ;;  %v2077_v17 = vpop.f32.mrb[19].mxu1  ;;  %v1897_v21 = vmul.f32 -1.442695, %v622_v14 }
 0xd50   :  { %2260 = vpow2.f32 %v1897_v21 }
 0xd58   :  { %v2259_v18 = vpop.eup %2258 }
 0xd59   :  { %635 = vrot.lane.b32.xlu0 %v2259_v18, %s2398_s25 }
 0xd5a   :  { %v2261_v22 = vpop.eup %2260 }
 0xd5b   :  { %v626_v23 = vadd.f32 1.0, %v2261_v22 }
 0xd5d   :  { %2262 = vrcp.f32 %v626_v23 }
 0xd67   :  { %v2263_v24 = vpop.eup %2262 }
 0xd68   :  { %v633_v28 = vmul.f32 %v2263_v24, %v631_v27 }
 0xdcb   :  { %v636_v25 = vpop.permute.xlu0 %635 }
 0xdcc   :  { %v638_v26 = vmul.f32 %v2263_v24, %v636_v25 }
 0xdce   :  { %640 = vrot.lane.b32.xlu1 %v638_v26, %s2399_s5 }
 0xe40   :  { %v641_v29 = vpop.permute.xlu1 %640 }
 0xe41   :  { %v643_v30 = vadd.f32 %v641_v29, %v633_v28 }
 0xe43   :  { %2264 = vtanh.f32 %v643_v30  ;;  %v709_v52 = vrot.slane %v643_v30, 6 }
 0xe4d   :  { %v2265_v31 = vpop.eup %2264 }
 0xe4e   :  { %646 = vrot.lane.b32.xlu0 %v2265_v31, %s2398_s25 }
 0xec0   :  { %v647_v32 = vpop.permute.xlu0 %646 }
 0xec1   :  { %v2619_v33 = vmul.f32 %v2263_v24, %v647_v32 }
 0xec3   :  { %v650_v34 = vpack.c.bf16 %v2619_v33, %v2619_v33 }
 0xec5   :  { %652 = vrot.lane.b32.xlu1 %v650_v34, %s2399_s5 }
 0xf37   :  { %v653_v36 = vpop.permute.xlu1 %652 }
 0xf38   :  { %2083 = vmatmul.mubr.msk.bf16.vlgmr.msra.gmra.mrb[8].mxu0 %vm199_vm5, %v653_v36 }
 0xf39   :  { %2095 = vmatpush3.bf16.msra.mxu0 %v2517_v19  ;;  %2098 = vmatprep.mubr.msk.bf16.mxu0 %vm2396_vm0, %v2395_v2 }
 0xf3a   :  { %2096 = vmatprep.subr.bf16.mxu0 %v2395_v2 }
 0xf3d   :  { %2097 = vmatpush3.bf16.msra.mxu0 %v2524_v20 }
0x100b   :  { %v691_v37 = vpop.f32.mrb[8].mxu0 }
0x100c   :  { %v698_v38 = vrot.slane %v691_v37, 6  ;;  %v2084_v41 = vpop.f32.mrb[9].mxu0 }
0x100d   :  { %v694_v42 = vpop.f32.mrb[10].mxu0 }
0x100e   :  { %v700_v43 = vadd.f32 %v698_v38, %v2553_v39  ;;  %v2085_v44 = vpop.f32.mrb[11].mxu0 }
0x1010   :  { %2266 = vtanh.f32 %v700_v43  ;;  %v1899_v46 = vmul.f32 -1.442695, %v700_v43 }
0x1012   :  { %2268 = vpow2.f32 %v1899_v46 }
0x101a   :  { %v2267_v45 = vpop.eup %2266 }
0x101b   :  { %713 = vrot.lane.b32.xlu0 %v2267_v45, %s2398_s25 }
0x101c   :  { %v2269_v47 = vpop.eup %2268 }
0x101d   :  { %v704_v48 = vadd.f32 1.0, %v2269_v47 }
0x101f   :  { %2270 = vrcp.f32 %v704_v48 }
0x1029   :  { %v2271_v49 = vpop.eup %2270 }
0x102a   :  { %v711_v53 = vmul.f32 %v2271_v49, %v709_v52 }
0x108d   :  { %v714_v50 = vpop.permute.xlu0 %713 }
0x108e   :  { %v716_v51 = vmul.f32 %v2271_v49, %v714_v50 }
0x1090   :  { %718 = vrot.lane.b32.xlu1 %v716_v51, %s2399_s5 }
0x1102   :  { %v719_v54 = vpop.permute.xlu1 %718 }
0x1103   :  { %v721_v55 = vadd.f32 %v719_v54, %v711_v53 }
0x1105   :  { %2272 = vtanh.f32 %v721_v55  ;;  %v788_v11 = vrot.slane %v721_v55, 6 }
0x110f   :  { %v2273_v56 = vpop.eup %2272 }
0x1110   :  { %724 = vrot.lane.b32.xlu0 %v2273_v56, %s2398_s25 }
0x1182   :  { %v725_v57 = vpop.permute.xlu0 %724 }
0x1183   :  { %v727_v58 = vmul.f32 %v2271_v49, %v725_v57 }
0x1185   :  { %v728_v59 = vpack.c.bf16 %v727_v58, %v727_v58  ;;  %v967_v18 = vsel %vm166_vm4, %v2619_v33, %v727_v58 }
0x1187   :  { %v730_v60 = vrot.slane %v728_v59, 1 }
0x1189   :  { %731 = vrot.lane.b32.xlu1 %v730_v60, %s2399_s5 }
0x11fb   :  { %v732_v61 = vpop.permute.xlu1 %731 }
0x11fc   :  { %2091 = vmatmul.mubr.msk.bf16.vlgmr.msra.gmra.mrb[20].mxu1 %vm199_vm5, %v732_v61 }
0x11fd   :  { %2103 = vmatpush3.bf16.msra.mxu1 %v2517_v19  ;;  %2106 = vmatprep.mubr.msk.bf16.mxu1 %vm2396_vm0, %v2395_v2 }
0x11fe   :  { %2104 = vmatprep.subr.bf16.mxu1 %v2395_v2 }
0x1201   :  { %2105 = vmatpush3.bf16.msra.mxu1 %v2524_v20 }
0x1202   :  { %2118 = vmatprep.subr.bf16.mxu1 %v2395_v2 }
0x12cf   :  { %v770_v62 = vpop.f32.mrb[20].mxu1 }
0x12d0   :  { %v777_v63 = vrot.slane %v770_v62, 4  ;;  %v2092_v0 = vpop.f32.mrb[21].mxu1 }
0x12d1   :  { %v773_v3 = vpop.f32.mrb[22].mxu1 }
0x12d2   :  { %v779_v4 = vadd.f32 %v777_v63, %v2553_v39  ;;  %v2093_v5 = vpop.f32.mrb[23].mxu1 }
0x12d3   :  { %v2220_v5 = vld [vmem:[%s2848_s6] sm:$0xff]  }
0x12d4   :  { %2274 = vtanh.f32 %v779_v4  ;;  %v1901_v19 = vmul.f32 -1.442695, %v779_v4  ;;  %2110 = vmatprep.subr.bf16.mxu0 %v2220_v5 }
0x12d6   :  { %2276 = vpow2.f32 %v1901_v19  ;;  %v2222_v19 = vld [vmem:[%s2848_s6 + $0x8] sm:$0xff]  }
0x12de   :  { %v2275_v6 = vpop.eup %2274 }
0x12df   :  { %792 = vrot.lane.b32.xlu0 %v2275_v6, %s2398_s25  ;;  %v2672_v6 = vld [vmem:[%s2849_s7] sm:$0xff]  }
0x12e0   :  { %v2277_v40 = vpop.eup %2276 }
0x12e1   :  { %v783_v7 = vadd.f32 1.0, %v2277_v40  ;;  %v2681_v40 = vld [vmem:[%s2849_s7 + $0x8] sm:$0xff]  }
0x12e3   :  { %2278 = vrcp.f32 %v783_v7 }
0x12ed   :  { %v2279_v8 = vpop.eup %2278 }
0x12ee   :  { %v790_v12 = vmul.f32 %v2279_v8, %v788_v11 }
0x1351   :  { %v793_v20 = vpop.permute.xlu0 %792 }
0x1352   :  { %v795_v9 = vmul.f32 %v2279_v8, %v793_v20 }
0x1354   :  { %797 = vrot.lane.b32.xlu1 %v795_v9, %s2399_s5 }
0x13c6   :  { %v798_v13 = vpop.permute.xlu1 %797 }
0x13c7   :  { %v800_v14 = vadd.f32 %v798_v13, %v790_v12 }
0x13c9   :  { %2280 = vtanh.f32 %v800_v14  ;;  %v867_v41 = vrot.slane %v800_v14, 6 }
0x13d3   :  { %v2281_v15 = vpop.eup %2280 }
0x13d4   :  { %803 = vrot.lane.b32.xlu0 %v2281_v15, %s2398_s25  ;;  %v1906_v15 = vld [vmem:[%s2850_s8] ss:$0 sm:$0xff] }
0x1446   :  { %v804_v16 = vpop.permute.xlu0 %803 }
0x1447   :  { %v806_v17 = vmul.f32 %v2279_v8, %v804_v16 }
0x1449   :  { %v807_v21 = vpack.c.bf16 %v806_v17, %v806_v17  ;;  %v968_v22 = vsel %vm963_vm6, %v967_v18, %v806_v17 }
0x144b   :  { %v809_v23 = vrot.slane %v807_v21, 2 }
0x144d   :  { %810 = vrot.lane.b32.xlu1 %v809_v23, %s2399_s5 }
0x14bf   :  { %v811_v24 = vpop.permute.xlu1 %810 }
0x14c0   :  { %2099 = vmatmul.mubr.msk.bf16.vlgmr.msra.gmra.mrb[12].mxu0 %vm199_vm5, %v811_v24 }
0x14c1   :  { %2111 = vmatpush3.bf16.msra.mxu0 %v2220_v5 }
0x14c2   :  { %2112 = vmatprep.subr.bf16.mxu0 %v2222_v19 }
0x14c5   :  { %2113 = vmatpush3.bf16.msra.mxu0 %v2222_v19 }
0x14c6   :  { %2126 = vmatprep.subr.bf16.mxu0 %v2395_v2 }
0x1593   :  { %v849_v25 = vpop.f32.mrb[12].mxu0 }
0x1594   :  { %v856_v26 = vrot.slane %v849_v25, 2  ;;  %v2100_v27 = vpop.f32.mrb[13].mxu0 }
0x1595   :  { %v852_v28 = vpop.f32.mrb[14].mxu0 }
0x1596   :  { %v858_v29 = vadd.f32 %v856_v26, %v2553_v39  ;;  %v2101_v30 = vpop.f32.mrb[15].mxu0 }
0x1598   :  { %2282 = vtanh.f32 %v858_v29  ;;  %v1903_v32 = vmul.f32 -1.442695, %v858_v29 }
0x159a   :  { %2284 = vpow2.f32 %v1903_v32 }
0x15a2   :  { %v2283_v31 = vpop.eup %2282 }
0x15a3   :  { %871 = vrot.lane.b32.xlu0 %v2283_v31, %s2398_s25 }
0x15a4   :  { %v2285_v33 = vpop.eup %2284 }
0x15a5   :  { %v862_v34 = vadd.f32 1.0, %v2285_v33 }
0x15a7   :  { %2286 = vrcp.f32 %v862_v34 }
0x15b1   :  { %v2287_v36 = vpop.eup %2286 }
0x15b2   :  { %v869_v42 = vmul.f32 %v2287_v36, %v867_v41 }
0x1615   :  { %v872_v37 = vpop.permute.xlu0 %871 }
0x1616   :  { %v874_v38 = vmul.f32 %v2287_v36, %v872_v37 }
0x1618   :  { %876 = vrot.lane.b32.xlu1 %v874_v38, %s2399_s5 }
0x168a   :  { %v877_v43 = vpop.permute.xlu1 %876 }
0x168b   :  { %v879_v44 = vadd.f32 %v877_v43, %v869_v42 }
0x168d   :  { %2288 = vtanh.f32 %v879_v44 }
0x1697   :  { %v2289_v39 = vpop.eup %2288 }
0x1698   :  { %882 = vrot.lane.b32.xlu0 %v2289_v39, %s2398_s25 }
0x170a   :  { %v883_v45 = vpop.permute.xlu0 %882 }
0x170b   :  { %v885_v46 = vmul.f32 %v2287_v36, %v883_v45 }
0x170d   :  { %v886_v47 = vpack.c.bf16 %v885_v46, %v885_v46  ;;  %v969_v48 = vsel %vm965_vm7, %v968_v22, %v885_v46 }
0x170e   :  { %v970_v49 = vpack.c.bf16 %v969_v48, %v2605_v10 }
0x170f   :  { %v888_v50 = vrot.slane %v886_v47, 3 }
0x1711   :  { %889 = vrot.lane.b32.xlu1 %v888_v50, %s2399_s5 }
0x1783   :  { %v890_v51 = vpop.permute.xlu1 %889 }
0x1784   :  { %2107 = vmatmul.mubr.msk.bf16.vlgmr.msra.gmra.mrb[24].mxu1 %vm199_vm5, %v890_v51 }
0x1785   :  { %2122 = vmatprep.mubr.msk.bf16.mxu1 %vm2396_vm0, %v2395_v2  ;;  %2119 = vmatpush3.bf16.msra.mxu1 %v2672_v6 }
0x1786   :  { %2120 = vmatprep.subr.bf16.mxu1 %v2395_v2 }
0x1789   :  { %2121 = vmatpush3.bf16.msra.mxu1 %v2681_v40 }
0x178a   :  { %2134 = vmatprep.subr.bf16.mxu1 %v2395_v2 }
0x178c   :  { %2123 = vmatmul.mubr.bf16.vlgmr.msra.gmra.mrb[28].mxu1 %v2394_v1 }
0x178d   :  { %2135 = vmatpush3.bf16.msra.mxu1 %v2672_v6  ;;  %2138 = vmatprep.mubr.msk.bf16.mxu1 %vm2396_vm0, %v2395_v2 }
0x178e   :  { %2136 = vmatprep.subr.bf16.mxu1 %v2395_v2 }
0x1791   :  { %2137 = vmatpush3.bf16.msra.mxu1 %v2681_v40 }
0x1792   :  { %2150 = vmatprep.subr.bf16.mxu1 %v2395_v2 }
0x1857   :  { %v928_v52 = vpop.f32.mrb[24].mxu1 }
0x1858   :  { %v934_v53 = vadd.f32 %v928_v52, %v2551_v35  ;;  %v2108_v54 = vpop.f32.mrb[25].mxu1  ;;  %v943_v35 = vrot.slane %v879_v44, 6 }
0x1859   :  { %v931_v55 = vpop.f32.mrb[26].mxu1 }
0x185a   :  { %2290 = vtanh.f32 %v934_v53  ;;  %v2109_v56 = vpop.f32.mrb[27].mxu1  ;;  %v1905_v10 = vmul.f32 -1.442695, %v934_v53 }
0x185c   :  { %2292 = vpow2.f32 %v1905_v10 }
0x185f   :  { %v1105_v1 = vpop.f32.mrb[28].mxu1 }
0x1860   :  { %v2124_v12 = vpop.f32.mrb[29].mxu1 }
0x1861   :  { %v1108_v13 = vpop.f32.mrb[30].mxu1 }
0x1862   :  { %v2125_v14 = vpop.f32.mrb[31].mxu1 }
0x1864   :  { %v2291_v57 = vpop.eup %2290 }
0x1865   :  { %947 = vrot.lane.b32.xlu0 %v2291_v57, %s2398_s25 }
0x1866   :  { %v2293_v58 = vpop.eup %2292 }
0x1867   :  { %v938_v59 = vadd.f32 1.0, %v2293_v58 }
0x1869   :  { %2294 = vrcp.f32 %v938_v59 }
0x1873   :  { %v2295_v60 = vpop.eup %2294 }
0x1874   :  { %v945_v63 = vmul.f32 %v2295_v60, %v943_v35 }
0x18d7   :  { %v948_v61 = vpop.permute.xlu0 %947 }
0x18d8   :  { %v950_v62 = vmul.f32 %v2295_v60, %v948_v61 }
0x18da   :  { %952 = vrot.lane.b32.xlu1 %v950_v62, %s2399_s5 }
0x18de   :  { %985 = vrot.lane.b32.xlu1 %v970_v49, %s2399_s5 }
0x194c   :  { %v953_v0 = vpop.permute.xlu1 %952 }
0x194d   :  { %v955_v3 = vadd.f32 %v953_v0, %v945_v63 }
0x194f   :  { %2296 = vtanh.f32 %v955_v3 }
0x1950   :  { %v986_v4 = vpop.permute.xlu1 %985 }
0x1951   :  { %2114 = vmatprep.mubr.msk.bf16.mxu0 %vm199_vm5, %v986_v4 }
0x1959   :  { %v2297_v7 = vpop.eup %2296 }
0x195a   :  { %958 = vrot.lane.b32.xlu0 %v2297_v7, %s2398_s25 }
0x19cc   :  { %v959_v8 = vpop.permute.xlu0 %958 }
0x19cd   :  { %v961_v20 = vmul.f32 %v2295_v60, %v959_v8 }
0x19cf   :  { %v971_v9 = vpack.c.bf16 %v961_v20, %v961_v20 }
0x19d1   :  { %987 = vrot.lane.b32.xlu0 %v971_v9, %s2399_s5 }
0x1a43   :  { %v988_v11 = vpop.permute.xlu0 %987 }
0x1a44   :  { %2115 = vmatmul.mubr.msk.bf16.vlgmr.msra.gmra.mrb[16].mxu0 %vm199_vm5, %v988_v11 }
0x1a45   :  { %2127 = vmatpush3.bf16.msra.mxu0 %v2672_v6  ;;  %2130 = vmatprep.mubr.msk.bf16.mxu0 %vm2396_vm0, %v2395_v2 }
0x1a46   :  { %2128 = vmatprep.subr.bf16.mxu0 %v2395_v2 }
0x1a49   :  { %2129 = vmatpush3.bf16.msra.mxu0 %v2681_v40 }
0x1a4a   :  { %2142 = vmatprep.subr.bf16.mxu0 %v2395_v2 }
0x1b17   :  { %v2116_v16 = vpop.f32.mrb[16].mxu0 }
0x1b18   :  { %v2706_v17 = vadd.f32 %v2116_v16, %v1906_v15  ;;  %v1041_v18 = vpop.f32.mrb[17].mxu0 }
0x1b19   :  { %v2708_v21 = vadd.f32 %v1906_v15, %v1041_v18  ;;  %v2117_v22 = vpop.f32.mrb[18].mxu0 }
0x1b1a   :  { %v1044_v23 = vpop.f32.mrb[19].mxu0 }
0x1b1b   :  { %v1111_v24 = vadd.f32 %v1105_v1, %v2708_v21  ;;  %v2711_v25 = vadd.f32 %v1906_v15, %v1044_v23 }
0x1b1d   :  { %2298 = vtanh.f32 %v1111_v24  ;;  %v1913_v27 = vmul.f32 -1.442695, %v1111_v24 }
0x1b1f   :  { %2300 = vpow2.f32 %v1913_v27 }
0x1b27   :  { %v2299_v26 = vpop.eup %2298 }
0x1b28   :  { %1121 = vrot.lane.b32.xlu1 %v2299_v26, %s2398_s25 }
0x1b29   :  { %v2301_v28 = vpop.eup %2300 }
0x1b2a   :  { %v1115_v29 = vadd.f32 1.0, %v2301_v28 }
0x1b2c   :  { %2302 = vrcp.f32 %v1115_v29 }
0x1b36   :  { %v2303_v30 = vpop.eup %2302 }
0x1b37   :  { %v1119_v33 = vmul.f32 0.0, %v2303_v30 }
0x1b9a   :  { %v1122_v31 = vpop.permute.xlu1 %1121 }
0x1b9b   :  { %v1124_v32 = vmul.f32 %v2303_v30, %v1122_v31 }
0x1b9d   :  { %1126 = vrot.lane.b32.xlu0 %v1124_v32, %s2399_s5 }
0x1c0f   :  { %v1127_v34 = vpop.permute.xlu0 %1126 }
0x1c10   :  { %v1129_v36 = vadd.f32 %v1127_v34, %v1119_v33 }
0x1c12   :  { %2304 = vtanh.f32 %v1129_v36  ;;  %v1195_v56 = vrot.slane %v1129_v36, 6 }
0x1c1c   :  { %v2305_v37 = vpop.eup %2304 }
0x1c1d   :  { %1132 = vrot.lane.b32.xlu1 %v2305_v37, %s2398_s25 }
0x1c8f   :  { %v1133_v38 = vpop.permute.xlu1 %1132 }
0x1c90   :  { %v2716_v41 = vmul.f32 %v2303_v30, %v1133_v38 }
0x1c92   :  { %v1136_v42 = vpack.c.bf16 %v2716_v41, %v2716_v41 }
0x1c94   :  { %1138 = vrot.lane.b32.xlu0 %v1136_v42, %s2399_s5 }
0x1d06   :  { %v1139_v43 = vpop.permute.xlu0 %1138 }
0x1d07   :  { %2131 = vmatmul.mubr.msk.bf16.vlgmr.msra.gmra.mrb[20].mxu0 %vm199_vm5, %v1139_v43 }
0x1d08   :  { %2143 = vmatpush3.bf16.msra.mxu0 %v2672_v6  ;;  %2146 = vmatprep.mubr.msk.bf16.mxu0 %vm2396_vm0, %v2395_v2 }
0x1d09   :  { %2144 = vmatprep.subr.bf16.mxu0 %v2395_v2 }
0x1d0c   :  { %2145 = vmatpush3.bf16.msra.mxu0 %v2681_v40 }
0x1d0d   :  { %2158 = vmatprep.subr.bf16.mxu0 %v2395_v2 }
0x1dda   :  { %v1177_v44 = vpop.f32.mrb[20].mxu0 }
0x1ddb   :  { %v1184_v39 = vrot.slane %v1177_v44, 6  ;;  %v2132_v45 = vpop.f32.mrb[21].mxu0 }
0x1ddc   :  { %v1180_v46 = vpop.f32.mrb[22].mxu0 }
0x1ddd   :  { %v1186_v47 = vadd.f32 %v1184_v39, %v2708_v21  ;;  %v2133_v48 = vpop.f32.mrb[23].mxu0 }
0x1ddf   :  { %2306 = vtanh.f32 %v1186_v47  ;;  %v1915_v50 = vmul.f32 -1.442695, %v1186_v47 }
0x1de1   :  { %2308 = vpow2.f32 %v1915_v50 }
0x1de9   :  { %v2307_v49 = vpop.eup %2306 }
0x1dea   :  { %1199 = vrot.lane.b32.xlu1 %v2307_v49, %s2398_s25 }
0x1deb   :  { %v2309_v51 = vpop.eup %2308 }
0x1dec   :  { %v1190_v52 = vadd.f32 1.0, %v2309_v51 }
0x1dee   :  { %2310 = vrcp.f32 %v1190_v52 }
0x1df8   :  { %v2311_v53 = vpop.eup %2310 }
0x1df9   :  { %v1197_v57 = vmul.f32 %v2311_v53, %v1195_v56 }
0x1e5c   :  { %v1200_v54 = vpop.permute.xlu1 %1199 }
0x1e5d   :  { %v1202_v55 = vmul.f32 %v2311_v53, %v1200_v54 }
0x1e5f   :  { %1204 = vrot.lane.b32.xlu0 %v1202_v55, %s2399_s5 }
0x1ed1   :  { %v1205_v10 = vpop.permute.xlu0 %1204 }
0x1ed2   :  { %v1207_v58 = vadd.f32 %v1205_v10, %v1197_v57 }
0x1ed4   :  { %2312 = vtanh.f32 %v1207_v58  ;;  %v1274_v14 = vrot.slane %v1207_v58, 6 }
0x1ede   :  { %v2313_v59 = vpop.eup %2312 }
0x1edf   :  { %1210 = vrot.lane.b32.xlu1 %v2313_v59, %s2398_s25 }
0x1f51   :  { %v1211_v60 = vpop.permute.xlu1 %1210 }
0x1f52   :  { %v1213_v61 = vmul.f32 %v2311_v53, %v1211_v60 }
0x1f54   :  { %v1214_v62 = vpack.c.bf16 %v1213_v61, %v1213_v61  ;;  %v1760_v26 = vsel %vm166_vm4, %v2716_v41, %v1213_v61 }
0x1f56   :  { %v1216_v35 = vrot.slane %v1214_v62, 1 }
0x1f58   :  { %1217 = vrot.lane.b32.xlu0 %v1216_v35, %s2399_s5 }
0x1fca   :  { %v1218_v63 = vpop.permute.xlu0 %1217 }
0x1fcb   :  { %2139 = vmatmul.mubr.msk.bf16.vlgmr.msra.gmra.mrb[32].mxu1 %vm199_vm5, %v1218_v63 }
0x1fcc   :  { %2151 = vmatpush3.bf16.msra.mxu1 %v2672_v6  ;;  %2154 = vmatprep.mubr.msk.bf16.mxu1 %vm2396_vm0, %v2395_v2 }
0x1fcd   :  { %2152 = vmatprep.subr.bf16.mxu1 %v2395_v2 }
0x1fd0   :  { %2153 = vmatpush3.bf16.msra.mxu1 %v2681_v40 }
0x1fd1   :  { %2166 = vmatprep.subr.bf16.mxu1 %v2395_v2 }
0x209e   :  { %v1256_v0 = vpop.f32.mrb[32].mxu1 }
0x209f   :  { %v1263_v3 = vrot.slane %v1256_v0, 4  ;;  %v2140_v4 = vpop.f32.mrb[33].mxu1 }
0x20a0   :  { %v1259_v5 = vpop.f32.mrb[34].mxu1 }
0x20a1   :  { %v1265_v19 = vadd.f32 %v1263_v3, %v2708_v21  ;;  %v2141_v7 = vpop.f32.mrb[35].mxu1 }
0x20a3   :  { %2314 = vtanh.f32 %v1265_v19  ;;  %v1917_v20 = vmul.f32 -1.442695, %v1265_v19 }
0x20a5   :  { %2316 = vpow2.f32 %v1917_v20 }
0x20ad   :  { %v2315_v8 = vpop.eup %2314 }
0x20ae   :  { %1278 = vrot.lane.b32.xlu1 %v2315_v8, %s2398_s25 }
0x20af   :  { %v2317_v9 = vpop.eup %2316 }
0x20b0   :  { %v1269_v11 = vadd.f32 1.0, %v2317_v9 }
0x20b2   :  { %2318 = vrcp.f32 %v1269_v11 }
0x20bc   :  { %v2319_v1 = vpop.eup %2318 }
0x20bd   :  { %v1276_v15 = vmul.f32 %v2319_v1, %v1274_v14 }
0x2120   :  { %v1279_v12 = vpop.permute.xlu1 %1278 }
0x2121   :  { %v1281_v13 = vmul.f32 %v2319_v1, %v1279_v12 }
0x2123   :  { %1283 = vrot.lane.b32.xlu0 %v1281_v13, %s2399_s5 }
0x2195   :  { %v1284_v16 = vpop.permute.xlu0 %1283 }
0x2196   :  { %v1286_v18 = vadd.f32 %v1284_v16, %v1276_v15 }
0x2198   :  { %2320 = vtanh.f32 %v1286_v18  ;;  %v1353_v46 = vrot.slane %v1286_v18, 6 }
0x21a2   :  { %v2321_v22 = vpop.eup %2320 }
0x21a3   :  { %1289 = vrot.lane.b32.xlu1 %v2321_v22, %s2398_s25 }
0x2215   :  { %v1290_v23 = vpop.permute.xlu1 %1289 }
0x2216   :  { %v1292_v24 = vmul.f32 %v2319_v1, %v1290_v23 }
0x2218   :  { %v1293_v27 = vpack.c.bf16 %v1292_v24, %v1292_v24  ;;  %v1761_v28 = vsel %vm963_vm6, %v1760_v26, %v1292_v24 }
0x221a   :  { %v1295_v29 = vrot.slane %v1293_v27, 2 }
0x221c   :  { %1296 = vrot.lane.b32.xlu0 %v1295_v29, %s2399_s5 }
0x228e   :  { %v1297_v30 = vpop.permute.xlu0 %1296 }
0x228f   :  { %2147 = vmatmul.mubr.msk.bf16.vlgmr.msra.gmra.mrb[24].mxu0 %vm199_vm5, %v1297_v30 }
0x2290   :  { %2159 = vmatpush3.bf16.msra.mxu0 %v2672_v6  ;;  %2162 = vmatprep.mubr.msk.bf16.mxu0 %vm2396_vm0, %v2395_v2 }
0x2291   :  { %2160 = vmatprep.subr.bf16.mxu0 %v2395_v2 }
0x2294   :  { %2161 = vmatpush3.bf16.msra.mxu0 %v2681_v40 }
0x2295   :  { %2174 = vmatprep.subr.bf16.mxu0 %v2395_v2 }
0x2362   :  { %v1335_v31 = vpop.f32.mrb[24].mxu0 }
0x2363   :  { %v1342_v32 = vrot.slane %v1335_v31, 2  ;;  %v2148_v33 = vpop.f32.mrb[25].mxu0 }
0x2364   :  { %v1338_v34 = vpop.f32.mrb[26].mxu0 }
0x2365   :  { %v1344_v36 = vadd.f32 %v1342_v32, %v2708_v21  ;;  %v2149_v37 = vpop.f32.mrb[27].mxu0 }
0x2367   :  { %2322 = vtanh.f32 %v1344_v36  ;;  %v1919_v41 = vmul.f32 -1.442695, %v1344_v36 }
0x2369   :  { %2324 = vpow2.f32 %v1919_v41 }
0x2371   :  { %v2323_v38 = vpop.eup %2322 }
0x2372   :  { %1357 = vrot.lane.b32.xlu1 %v2323_v38, %s2398_s25 }
0x2373   :  { %v2325_v42 = vpop.eup %2324 }
0x2374   :  { %v1348_v43 = vadd.f32 1.0, %v2325_v42 }
0x2376   :  { %2326 = vrcp.f32 %v1348_v43 }
0x2380   :  { %v2327_v44 = vpop.eup %2326 }
0x2381   :  { %v1355_v47 = vmul.f32 %v2327_v44, %v1353_v46 }
0x23e4   :  { %v1358_v39 = vpop.permute.xlu1 %1357 }
0x23e5   :  { %v1360_v45 = vmul.f32 %v2327_v44, %v1358_v39 }
0x23e7   :  { %1362 = vrot.lane.b32.xlu0 %v1360_v45, %s2399_s5 }
0x2459   :  { %v1363_v48 = vpop.permute.xlu0 %1362 }
0x245a   :  { %v1365_v49 = vadd.f32 %v1363_v48, %v1355_v47 }
0x245c   :  { %2328 = vtanh.f32 %v1365_v49  ;;  %v1429_v4 = vrot.slane %v1365_v49, 6 }
0x2466   :  { %v2329_v21 = vpop.eup %2328 }
0x2467   :  { %1368 = vrot.lane.b32.xlu1 %v2329_v21, %s2398_s25 }
0x24d9   :  { %v1369_v50 = vpop.permute.xlu1 %1368 }
0x24da   :  { %v1371_v51 = vmul.f32 %v2327_v44, %v1369_v50 }
0x24dc   :  { %v1372_v52 = vpack.c.bf16 %v1371_v51, %v1371_v51  ;;  %v2760_v53 = vsel %vm965_vm7, %v1761_v28, %v1371_v51 }
0x24de   :  { %v1374_v54 = vrot.slane %v1372_v52, 3 }
0x24e0   :  { %1375 = vrot.lane.b32.xlu0 %v1374_v54, %s2399_s5 }
0x2552   :  { %v1376_v55 = vpop.permute.xlu0 %1375 }
0x2553   :  { %2155 = vmatmul.mubr.msk.bf16.vlgmr.msra.gmra.mrb[36].mxu1 %vm199_vm5, %v1376_v55 }
0x2554   :  { %2167 = vmatpush3.bf16.msra.mxu1 %v2672_v6  ;;  %2170 = vmatprep.mubr.msk.bf16.mxu1 %vm2396_vm0, %v2395_v2 }
0x2555   :  { %2168 = vmatprep.subr.bf16.mxu1 %v2395_v2 }
0x2558   :  { %2169 = vmatpush3.bf16.msra.mxu1 %v2681_v40 }
0x2559   :  { %2182 = vmatprep.subr.bf16.mxu1 %v2395_v2 }
0x2626   :  { %v1414_v56 = vpop.f32.mrb[36].mxu1 }
0x2627   :  { %v1420_v57 = vadd.f32 %v1414_v56, %v2711_v25  ;;  %v2156_v10 = vpop.f32.mrb[37].mxu1 }
0x2628   :  { %v1417_v58 = vpop.f32.mrb[38].mxu1 }
0x2629   :  { %2330 = vtanh.f32 %v1420_v57  ;;  %v2157_v59 = vpop.f32.mrb[39].mxu1  ;;  %v1921_v61 = vmul.f32 -1.442695, %v1420_v57 }
0x262b   :  { %2332 = vpow2.f32 %v1921_v61 }
0x2633   :  { %v2331_v60 = vpop.eup %2330 }
0x2634   :  { %1433 = vrot.lane.b32.xlu1 %v2331_v60, %s2398_s25 }
0x2635   :  { %v2333_v62 = vpop.eup %2332 }
0x2636   :  { %v1424_v35 = vadd.f32 1.0, %v2333_v62 }
0x2638   :  { %2334 = vrcp.f32 %v1424_v35 }
0x2642   :  { %v2335_v63 = vpop.eup %2334 }
0x2643   :  { %v1431_v5 = vmul.f32 %v2335_v63, %v1429_v4 }
0x26a6   :  { %v1434_v0 = vpop.permute.xlu1 %1433 }
0x26a7   :  { %v1436_v3 = vmul.f32 %v2335_v63, %v1434_v0 }
0x26a9   :  { %1438 = vrot.lane.b32.xlu0 %v1436_v3, %s2399_s5 }
0x271b   :  { %v1439_v19 = vpop.permute.xlu0 %1438 }
0x271c   :  { %v1441_v7 = vadd.f32 %v1439_v19, %v1431_v5 }
0x271e   :  { %2336 = vtanh.f32 %v1441_v7  ;;  %v1507_v30 = vrot.slane %v1441_v7, 6 }
0x2728   :  { %v2337_v8 = vpop.eup %2336 }
0x2729   :  { %1444 = vrot.lane.b32.xlu1 %v2337_v8, %s2398_s25 }
0x279b   :  { %v1445_v20 = vpop.permute.xlu1 %1444 }
0x279c   :  { %v2774_v9 = vmul.f32 %v2335_v63, %v1445_v20 }
0x279e   :  { %v1448_v11 = vpack.c.bf16 %v2774_v9, %v2774_v9 }
0x27a0   :  { %1450 = vrot.lane.b32.xlu0 %v1448_v11, %s2399_s5 }
0x2812   :  { %v1451_v1 = vpop.permute.xlu0 %1450 }
0x2813   :  { %2163 = vmatmul.mubr.msk.bf16.vlgmr.msra.gmra.mrb[28].mxu0 %vm199_vm5, %v1451_v1 }
0x2814   :  { %2175 = vmatpush3.bf16.msra.mxu0 %v2672_v6  ;;  %2178 = vmatprep.mubr.msk.bf16.mxu0 %vm2396_vm0, %v2395_v2 }
0x2815   :  { %2176 = vmatprep.subr.bf16.mxu0 %v2395_v2 }
0x2818   :  { %2177 = vmatpush3.bf16.msra.mxu0 %v2681_v40 }
0x28e6   :  { %v1489_v12 = vpop.f32.mrb[28].mxu0 }
0x28e7   :  { %v1496_v13 = vrot.slane %v1489_v12, 6  ;;  %v2164_v14 = vpop.f32.mrb[29].mxu0 }
0x28e8   :  { %v1492_v15 = vpop.f32.mrb[30].mxu0 }
0x28e9   :  { %v1498_v16 = vadd.f32 %v1496_v13, %v2711_v25  ;;  %v2165_v18 = vpop.f32.mrb[31].mxu0 }
0x28eb   :  { %2338 = vtanh.f32 %v1498_v16  ;;  %v1923_v23 = vmul.f32 -1.442695, %v1498_v16 }
0x28ed   :  { %2340 = vpow2.f32 %v1923_v23 }
0x28f5   :  { %v2339_v22 = vpop.eup %2338 }
0x28f6   :  { %1511 = vrot.lane.b32.xlu1 %v2339_v22, %s2398_s25 }
0x28f7   :  { %v2341_v24 = vpop.eup %2340 }
0x28f8   :  { %v1502_v26 = vadd.f32 1.0, %v2341_v24 }
0x28fa   :  { %2342 = vrcp.f32 %v1502_v26 }
0x2904   :  { %v2343_v27 = vpop.eup %2342 }
0x2905   :  { %v1509_v31 = vmul.f32 %v2343_v27, %v1507_v30 }
0x2968   :  { %v1512_v28 = vpop.permute.xlu1 %1511 }
0x2969   :  { %v1514_v29 = vmul.f32 %v2343_v27, %v1512_v28 }
0x296b   :  { %1516 = vrot.lane.b32.xlu0 %v1514_v29, %s2399_s5 }
0x29dd   :  { %v1517_v32 = vpop.permute.xlu0 %1516 }
0x29de   :  { %v1519_v33 = vadd.f32 %v1517_v32, %v1509_v31 }
0x29e0   :  { %2344 = vtanh.f32 %v1519_v33 }
0x29ea   :  { %v2345_v34 = vpop.eup %2344 }
0x29eb   :  { %1522 = vrot.lane.b32.xlu1 %v2345_v34, %s2398_s25 }
0x2a5d   :  { %v1523_v36 = vpop.permute.xlu1 %1522 }
0x2a5e   :  { %v1525_v37 = vmul.f32 %v2343_v27, %v1523_v36 }
0x2a60   :  { %v1526_v38 = vpack.c.bf16 %v1525_v37, %v1525_v37  ;;  %v1763_v58 = vsel %vm166_vm4, %v2774_v9, %v1525_v37 }
0x2a62   :  { %v1528_v41 = vrot.slane %v1526_v38, 1 }
0x2a64   :  { %1529 = vrot.lane.b32.xlu0 %v1528_v41, %s2399_s5 }
0x2ad6   :  { %v1530_v42 = vpop.permute.xlu0 %1529 }
0x2ad7   :  { %2171 = vmatmul.mubr.msk.bf16.vlgmr.msra.gmra.mrb[40].mxu1 %vm199_vm5, %v1530_v42 }
0x2ad8   :  { %2183 = vmatpush3.bf16.msra.mxu1 %v2672_v6  ;;  %2186 = vmatprep.mubr.msk.bf16.mxu1 %vm2396_vm0, %v2395_v2 }
0x2ad9   :  { %2184 = vmatprep.subr.bf16.mxu1 %v2395_v2 }
0x2adc   :  { %2185 = vmatpush3.bf16.msra.mxu1 %v2681_v40  ;;  %v1586_v40 = vrot.slane %v1519_v33, 6 }
0x2baa   :  { %v1568_v43 = vpop.f32.mrb[40].mxu1 }
0x2bab   :  { %v1575_v44 = vrot.slane %v1568_v43, 4  ;;  %v2172_v39 = vpop.f32.mrb[41].mxu1 }
0x2bac   :  { %v1571_v45 = vpop.f32.mrb[42].mxu1 }
0x2bad   :  { %v1577_v46 = vadd.f32 %v1575_v44, %v2711_v25  ;;  %v2173_v47 = vpop.f32.mrb[43].mxu1  ;;  %v2224_v45 = vld [vmem:[%s2851_s9] sm:$0xff]  }
0x2bae   :  { %2190 = vmatprep.subr.bf16.mxu0 %v2224_v45 }
0x2baf   :  { %2346 = vtanh.f32 %v1577_v46  ;;  %v1925_v49 = vmul.f32 -1.442695, %v1577_v46  ;;  %v2225_v46 = vld [vmem:[%s2851_s9 + $0x8] sm:$0xff]   ;;  %s2400_s9 = smov [#allocation2]  }
0x2bb0   :  { %s1859_s2 = sshll.u32 %s2400_s9, 4  ;;  %s1860_s2 = int_to_ptr.vmem [resolvable:$true] %s1859_s2 }
0x2bb1   :  { %2348 = vpow2.f32 %v1925_v49  ;;  %s2370_s19 = scalar_lea.vmem %s1860_s2, 384  ;;  %p2375_p1 = scmp.lt.s32.totalorder %s1860_s2, %s1860_s2 }
0x2bb2   :  { %p2371_p0 = scmp.ne.s32.totalorder %s1860_s2, %s2370_s19  ;;  %p2376_p2 = scmp.lt.s32.totalorder %s2370_s19, %s2370_s19 }
0x2bb4   :  { %p2377_p3 = por %p2376_p2, %p2375_p1 }
0x2bb6   :  { %p2378_p4 = pnand %p2377_p3, %p2371_p0 }
0x2bb9   :  { %v2347_v48 = vpop.eup %2346 }
0x2bba   :  { %1590 = vrot.lane.b32.xlu1 %v2347_v48, %s2398_s25 }
0x2bbb   :  { %v2349_v6 = vpop.eup %2348 }
0x2bbc   :  { %v1581_v21 = vadd.f32 1.0, %v2349_v6 }
0x2bbe   :  { %2350 = vrcp.f32 %v1581_v21 }
0x2bc8   :  { %v2351_v50 = vpop.eup %2350 }
0x2bc9   :  { %v1588_v52 = vmul.f32 %v2351_v50, %v1586_v40 }
0x2c2c   :  { %v1591_v2 = vpop.permute.xlu1 %1590 }
0x2c2d   :  { %v1593_v51 = vmul.f32 %v2351_v50, %v1591_v2 }
0x2c2f   :  { %1595 = vrot.lane.b32.xlu0 %v1593_v51, %s2399_s5 }
0x2ca1   :  { %v1596_v54 = vpop.permute.xlu0 %1595 }
0x2ca2   :  { %v1598_v55 = vadd.f32 %v1596_v54, %v1588_v52 }
0x2ca4   :  { %2352 = vtanh.f32 %v1598_v55  ;;  %v1665_v12 = vrot.slane %v1598_v55, 6 }
0x2cae   :  { %v2353_v56 = vpop.eup %2352 }
0x2caf   :  { %1601 = vrot.lane.b32.xlu1 %v2353_v56, %s2398_s25 }
0x2d21   :  { %v1602_v57 = vpop.permute.xlu1 %1601 }
0x2d22   :  { %v1604_v10 = vmul.f32 %v2351_v50, %v1602_v57  ;;  %v1930_v50 = vld [vmem:[%s2852_s10] ss:$0 sm:$0xff] }
0x2d24   :  { %v1605_v59 = vpack.c.bf16 %v1604_v10, %v1604_v10  ;;  %v1764_v60 = vsel %vm963_vm6, %v1763_v58, %v1604_v10 }
0x2d26   :  { %v1607_v61 = vrot.slane %v1605_v59, 2 }
0x2d28   :  { %1608 = vrot.lane.b32.xlu0 %v1607_v61, %s2399_s5 }
0x2d9a   :  { %v1609_v62 = vpop.permute.xlu0 %1608 }
0x2d9b   :  { %2179 = vmatmul.mubr.msk.bf16.vlgmr.msra.gmra.mrb[32].mxu0 %vm199_vm5, %v1609_v62 }
0x2d9c   :  { %2191 = vmatpush3.bf16.msra.mxu0 %v2224_v45 }
0x2d9d   :  { %2192 = vmatprep.subr.bf16.mxu0 %v2225_v46 }
0x2da0   :  { %2193 = vmatpush3.bf16.msra.mxu0 %v2225_v46 }
0x2e6e   :  { %v1647_v35 = vpop.f32.mrb[32].mxu0 }
0x2e6f   :  { %v1654_v63 = vrot.slane %v1647_v35, 2  ;;  %v2180_v0 = vpop.f32.mrb[33].mxu0 }
0x2e70   :  { %v1650_v3 = vpop.f32.mrb[34].mxu0 }
0x2e71   :  { %v1656_v4 = vadd.f32 %v1654_v63, %v2711_v25  ;;  %v2181_v5 = vpop.f32.mrb[35].mxu0 }
0x2e73   :  { %2354 = vtanh.f32 %v1656_v4  ;;  %v1927_v7 = vmul.f32 -1.442695, %v1656_v4 }
0x2e75   :  { %2356 = vpow2.f32 %v1927_v7 }
0x2e7d   :  { %v2355_v19 = vpop.eup %2354 }
0x2e7e   :  { %1669 = vrot.lane.b32.xlu1 %v2355_v19, %s2398_s25 }
0x2e7f   :  { %v2357_v8 = vpop.eup %2356 }
0x2e80   :  { %v1660_v20 = vadd.f32 1.0, %v2357_v8 }
0x2e82   :  { %2358 = vrcp.f32 %v1660_v20 }
0x2e8c   :  { %v2359_v9 = vpop.eup %2358 }
0x2e8d   :  { %v1667_v13 = vmul.f32 %v2359_v9, %v1665_v12 }
0x2ef0   :  { %v1670_v11 = vpop.permute.xlu1 %1669 }
0x2ef1   :  { %v1672_v1 = vmul.f32 %v2359_v9, %v1670_v11 }
0x2ef3   :  { %1674 = vrot.lane.b32.xlu0 %v1672_v1, %s2399_s5 }
0x2f65   :  { %v1675_v14 = vpop.permute.xlu0 %1674 }
0x2f66   :  { %v1677_v15 = vadd.f32 %v1675_v14, %v1667_v13 }
0x2f68   :  { %2360 = vtanh.f32 %v1677_v15 }
0x2f72   :  { %v2361_v25 = vpop.eup %2360 }
0x2f73   :  { %1680 = vrot.lane.b32.xlu1 %v2361_v25, %s2398_s25 }
0x2fe5   :  { %v1681_v16 = vpop.permute.xlu1 %1680 }
0x2fe6   :  { %v1683_v18 = vmul.f32 %v2359_v9, %v1681_v16 }
0x2fe8   :  { %v1684_v22 = vpack.c.bf16 %v1683_v18, %v1683_v18  ;;  %v1765_v23 = vsel %vm965_vm7, %v1764_v60, %v1683_v18 }
0x2fe9   :  { %v1766_v24 = vpack.c.bf16 %v1765_v23, %v2760_v53 }
0x2fea   :  { %v1686_v26 = vrot.slane %v1684_v22, 3 }
0x2fec   :  { %1687 = vrot.lane.b32.xlu0 %v1686_v26, %s2399_s5 }
0x305e   :  { %v1688_v27 = vpop.permute.xlu0 %1687 }
0x305f   :  { %2187 = vmatmul.mubr.msk.bf16.vlgmr.msra.gmra.mrb[44].mxu1 %vm199_vm5, %v1688_v27 }
0x3132   :  { %v1726_v28 = vpop.f32.mrb[44].mxu1 }
0x3133   :  { %v1732_v29 = vadd.f32 %v1726_v28, %v2706_v17  ;;  %v2188_v30 = vpop.f32.mrb[45].mxu1  ;;  %v1741_v17 = vrot.slane %v1677_v15, 6 }
0x3134   :  { %v1729_v31 = vpop.f32.mrb[46].mxu1 }
0x3135   :  { %2362 = vtanh.f32 %v1732_v29  ;;  %v2189_v32 = vpop.f32.mrb[47].mxu1  ;;  %v1929_v34 = vmul.f32 -1.442695, %v1732_v29 }
0x3137   :  { %2364 = vpow2.f32 %v1929_v34 }
0x313f   :  { %v2363_v33 = vpop.eup %2362 }
0x3140   :  { %1745 = vrot.lane.b32.xlu1 %v2363_v33, %s2398_s25 }
0x3141   :  { %v2365_v36 = vpop.eup %2364 }
0x3142   :  { %v1736_v53 = vadd.f32 1.0, %v2365_v36 }
0x3144   :  { %2366 = vrcp.f32 %v1736_v53 }
0x314e   :  { %v2367_v37 = vpop.eup %2366 }
0x314f   :  { %v1743_v42 = vmul.f32 %v2367_v37, %v1741_v17 }
0x31b2   :  { %v1746_v38 = vpop.permute.xlu1 %1745 }
0x31b3   :  { %v1748_v41 = vmul.f32 %v2367_v37, %v1746_v38 }
0x31b5   :  { %1750 = vrot.lane.b32.xlu0 %v1748_v41, %s2399_s5 }
0x31b9   :  { %1781 = vrot.lane.b32.xlu0 %v1766_v24, %s2399_s5 }
0x3227   :  { %v1751_v43 = vpop.permute.xlu0 %1750 }
0x3228   :  { %v1753_v44 = vadd.f32 %v1751_v43, %v1743_v42 }
0x322a   :  { %2368 = vtanh.f32 %v1753_v44 }
0x322b   :  { %v1782_v39 = vpop.permute.xlu0 %1781 }
0x322c   :  { %2194 = vmatprep.mubr.msk.bf16.mxu0 %vm199_vm5, %v1782_v39 }
0x3234   :  { %v2369_v47 = vpop.eup %2368 }
0x3235   :  { %1756 = vrot.lane.b32.xlu1 %v2369_v47, %s2398_s25 }
0x32a7   :  { %v1757_v48 = vpop.permute.xlu1 %1756 }
0x32a8   :  { %v1759_v49 = vmul.f32 %v2367_v37, %v1757_v48 }
0x32aa   :  { %v1767_v6 = vpack.c.bf16 %v1759_v49, %v1759_v49 }
0x32ac   :  { %1783 = vrot.lane.b32.xlu1 %v1767_v6, %s2399_s5 }
0x331e   :  { %v1784_v21 = vpop.permute.xlu1 %1783 }
0x331f   :  { %2195 = vmatmul.mubr.msk.bf16.vlgmr.msra.gmra.mrb[36].mxu0 %vm199_vm5, %v1784_v21 }
0x33f2   :  { %v2196_v2 = vpop.f32.mrb[36].mxu0 }
0x33f3   :  { %v1846_v51 = vadd.f32 %v2196_v2, %v1930_v50  ;;  %v1837_v40 = vpop.f32.mrb[37].mxu0 }
0x33f4   :  { %v1838_v52 = vadd.f32 %v1930_v50, %v1837_v40  ;;  %v2197_v54 = vpop.f32.mrb[38].mxu0 }
0x33f5   :  { %1853 = vst [vmem:[#allocation2 + $0x10] sm:$0x3] %v1846_v51  ;;  %v1840_v55 = vpop.f32.mrb[39].mxu0 }
0x33f6   :  { %1851 = vst [vmem:[#allocation2] sm:$0xff] %v1838_v52  ;;  %v1841_v56 = vadd.f32 %v1930_v50, %v1840_v55 }
0x33f8   :  { %1852 = vst [vmem:[#allocation2 + $0x8] sm:$0xff] %v1841_v56 }
0x33f9   :  { %2381 = shalt.err (!%p2378_p4)
}
0x33fa   :  { %s2382_s21 = scalar_lea.hbm %s2853_s11, 384 }
0x33fb   :  { %p2383_p5 = scmp.ne.s32.totalorder %s2853_s11, %s2382_s21  ;;  %p2386_p6 = scmp.lt.u32.totalorder %s2382_s21, %s2853_s11 }
0x33fd   :  { %p2388_p7 = pnand %p2386_p6, %p2383_p5 }
0x33ff   :  { %2391 = shalt.err (!%p2388_p7)
}
0x3400   :  { %s2401_s1 = smov 128   ;;  %s2402_s4 = smov 8  }
0x3401   :  { %1865 = dma.vmem_to_hbm [thread:$0]  %s1860_s2, 384, %s2853_s11, [#allocation3], %s2401_s1, %s2401_s1, %s2402_s4  }
0x3402   :  { %2392 = dma.done.wait [#allocation3], 384  }
0x3403   :  { %2393 = vsyncadd [#allocation3], 4294966912 }
0x3404   :  { %1869 = vsyncpa [#allocation3], 1 }

</bundles_post_ra>
